<compile_context>
chip_gen: v6e
topology: v6e:2x2x1
jax: 0.10.0
libtpu: 0.0.40
codegen_flags: <defaults>
</compile_context>

<pallas_src>
import functools
import math

import numpy as np
import jax
import jax.numpy as jnp
from jax.experimental import pallas as pl
from jax.experimental.pallas import tpu as pltpu

EPS = 1e-5          # nn.GroupNorm default eps
EXPANSION = 4


def _round_up(x, m):
    return ((x + m - 1) // m) * m


# ---------------------------------------------------------------------------
# In-kernel helper: per-(channel, sample) instance norm + affine on (C, B*L)
# ---------------------------------------------------------------------------
def _instance_norm_affine(y, r_ref, e_ref, inv_count, g, b):
    """r_ref: (B*L, B) 0/1 per-sample reduce, e_ref: (B, B*L) broadcast back.

    Returns (normalised slab, c) where c = b - mean*rsqrt(var+eps)*g is the
    value a zero element of that (channel, sample) maps to (used for the conv2
    zero-padding border columns)."""
    s1 = jnp.dot(y, r_ref[...], preferred_element_type=jnp.float32)      # (C, B)
    s2 = jnp.dot(y * y, r_ref[...], preferred_element_type=jnp.float32)  # (C, B)
    mean = s1 * inv_count
    var = jnp.maximum(s2 * inv_count - mean * mean, 0.0)  # single-pass, clamped
    a = jax.lax.rsqrt(var + EPS) * g                      # (C, B)
    c = b - mean * a                                      # (C, B)
    yn = (y * jnp.dot(a, e_ref[...], preferred_element_type=jnp.float32)
          + jnp.dot(c, e_ref[...], preferred_element_type=jnp.float32))
    return yn, c


# ---------------------------------------------------------------------------
# Fused kernel: one grid step = B samples, channels-first (C, B*L) slabs
# ---------------------------------------------------------------------------
def _bottleneck_kernel(*refs, L, Lp, Lm, W, Pp, has_proj, cdt):
    (x_ref, w1_ref, g1_ref, b1_ref, w2s_ref, g2_ref, b2_ref,
     w3_ref, g3_ref, b3_ref) = refs[0:10]
    if has_proj:
        ws_ref, gs_ref, bs_ref = refs[10:13]
        rest = refs[13:]
    else:
        rest = refs[10:]
    (r1_ref, e1_ref, mdn_ref, mup_ref, mmain_ref, mbord_ref,
     r3_ref, e3_ref, msc_ref, o_ref) = rest

    f32 = jnp.float32
    x = x_ref[...]                                              # (Cinp, B*L)

    # ---- conv1 (1x1) + InstanceNorm + ReLU ------------------------------
    y = jnp.dot(w1_ref[...], x, preferred_element_type=f32)    # (Pp, B*L)
    y, _ = _instance_norm_affine(y, r1_ref, e1_ref, 1.0 / L,
                                 g1_ref[...], b1_ref[...])
    y = jnp.maximum(y, 0.0)

    # ---- conv2 (3,1), padding=(1,1): one MXU push for all three taps ----
    z = jnp.dot(w2s_ref[...], y.astype(cdt), preferred_element_type=f32)  # (3Pp, B*L)
    t_dn, t_md, t_up = z[0:Pp], z[Pp:2 * Pp], z[2 * Pp:3 * Pp]
    bl = t_dn.shape[1]
    # H-shift of the tap partial products: XLU rolls + 0/1 boundary masks
    # (mask also kills any cross-sample wrap of the roll).
    y2 = (pltpu.roll(t_dn, shift=W, axis=1) * mdn_ref[...]
          + t_md
          + pltpu.roll(t_up, shift=bl - W, axis=1) * mup_ref[...])
    # IN2 statistics run over the padded H*(W+2) extent; the two zero
    # W-border columns contribute nothing to the sums -> only the count (Lp).
    y2, c2 = _instance_norm_affine(y2, r1_ref, e1_ref, 1.0 / Lp,
                                   g2_ref[...], b2_ref[...])
    y2 = jnp.maximum(y2, 0.0)
    border = jnp.maximum(c2, 0.0)      # post-IN2+ReLU value of the zero borders

    # ---- place interior into padded layout (+ AvgPool if stride != 1) ---
    zmain = (jnp.dot(y2, mmain_ref[...], preferred_element_type=f32)
             + jnp.dot(border, mbord_ref[...], preferred_element_type=f32))  # (Pp, B*Lm)

    # ---- conv3 (1x1) + InstanceNorm (no ReLU) ----------------------------
    y3 = jnp.dot(w3_ref[...], zmain.astype(cdt), preferred_element_type=f32)  # (C4p, B*Lm)
    y3, _ = _instance_norm_affine(y3, r3_ref, e3_ref, 1.0 / Lm,
                                  g3_ref[...], b3_ref[...])

    # ---- shortcut --------------------------------------------------------
    if has_proj:
        s = jnp.dot(ws_ref[...], x, preferred_element_type=f32)              # (C4p, B*L)
        s = jnp.dot(s, msc_ref[...], preferred_element_type=f32)             # pool + broadcast
        s, _ = _instance_norm_affine(s, r3_ref, e3_ref, 1.0 / Lm,
                                     gs_ref[...], bs_ref[...])
    else:
        s = jnp.dot(x.astype(f32), msc_ref[...], preferred_element_type=f32)  # broadcast only

    o_ref[...] = jnp.maximum(y3 + s, 0.0).astype(o_ref.dtype)


# ---------------------------------------------------------------------------
# Host-side geometry / constants (vectorised numpy, cached per shape)
# ---------------------------------------------------------------------------
def _geometry(H, W, do_pool, has_proj):
    Wp = W + 2
    if do_pool:
        Hm, Wm = (H - 2) // 2 + 1, (Wp - 1) // 2 + 1
    else:
        Hm, Wm = H, Wp
    if has_proj:
        Hs, Ws = (H - 2) // 2 + 1, (W - 1) // 2 + 1
    else:
        Hs, Ws = H, W
    return Wp, Hm, Wm, Hs, Ws


@functools.lru_cache(maxsize=None)
def _spatial_constants(H, W, do_pool, has_proj, B):
    """Per-(shape, stride, fold-factor) constants; cached as device arrays."""
    Wp, Hm, Wm, Hs, Ws = _geometry(H, W, do_pool, has_proj)
    L, Lm = H * W, Hm * Wm

    # main path: interior -> padded (+pooled) layout; zero-border injection
    s_main = np.zeros((L, Lm), np.float32)
    bordv = np.zeros((Lm,), np.float32)
    ii = np.arange(Hm)
    if do_pool:
        for j in range(Wm):
            src_col = 2 * j                       # padded-W column read by the pool
            if src_col == 0 or src_col == Wp - 1:  # zero-padding border column
                bordv[ii * Wm + j] = 1.0           # 0.5 + 0.5 from the two H taps
            else:
                w = src_col - 1
                for dh in (0, 1):
                    s_main[(2 * ii + dh) * W + w, ii * Wm + j] = 0.5
    else:
        hh = np.arange(H)[:, None]
        ww = np.arange(W)[None, :]
        s_main[(hh * W + ww).ravel(), (hh * Wp + ww + 1).ravel()] = 1.0
        bordv[np.arange(H) * Wp] = 1.0
        bordv[np.arange(H) * Wp + (Wp - 1)] = 1.0

    # shortcut: (AvgPool2d((2,1),2) if projected) composed with the residual
    # W/H broadcast, as a single interior -> output-layout matrix.
    s_sc = np.zeros((L, Lm), np.float32)
    I, J = np.meshgrid(np.arange(Hm), np.arange(Wm), indexing="ij")
    SI = I if Hs == Hm else np.zeros_like(I)
    SJ = J if Ws == Wm else np.zeros_like(J)
    cols = (I * Wm + J).ravel()
    if has_proj:
        for dh in (0, 1):
            s_sc[((2 * SI + dh) * W + 2 * SJ).ravel(), cols] += 0.5
    else:
        s_sc[(SI * W + SJ).ravel(), cols] = 1.0

    # conv2 H-shift boundary masks (zero the rows falling off each sample)
    pos = np.arange(B * L) % L
    mdn = (pos >= W).astype(np.float32)[None, :]
    mup = (pos < L - W).astype(np.float32)[None, :]

    eye_b = np.eye(B, dtype=np.float32)
    r1 = np.repeat(eye_b, L, axis=0)              # (B*L, B) per-sample reduce
    r3 = np.repeat(eye_b, Lm, axis=0)             # (B*Lm, B)

    return {
        "r1": jnp.asarray(r1),
        "e1": jnp.asarray(np.ascontiguousarray(r1.T)),
        "mdn": jnp.asarray(mdn),
        "mup": jnp.asarray(mup),
        "mmain": jnp.asarray(np.kron(eye_b, s_main)),
        "mbord": jnp.asarray(np.kron(eye_b, bordv[None, :])),
        "r3": jnp.asarray(r3),
        "e3": jnp.asarray(np.ascontiguousarray(r3.T)),
        "msc": jnp.asarray(np.kron(eye_b, s_sc)),
    }


def _fold_factor(n, L, Lm, cap=32):
    """Samples folded per grid step so folded lane extents are 128-aligned."""
    need = lambda x: 128 // math.gcd(128, x)
    b = max(need(L), need(Lm))          # powers of two dividing 128
    if b > cap:
        # TODO(synk): odd spatial sizes would need a 128x fold; fall back to a
        # single full-batch step (block == full array, so no tiling constraint).
        return max(n, 1)
    return b


# ---------------------------------------------------------------------------
# Wrapper
# ---------------------------------------------------------------------------
def bottleneck_ap_forward(x_nchw, params, *, stride, mxu_dtype=jnp.float32):
    N, Cin, H, W = x_nchw.shape
    P = params["w1"].shape[0]
    C4 = EXPANSION * P
    do_pool = stride != 1
    has_proj = (stride != 1) or (Cin != C4)

    Wp, Hm, Wm, Hs, Ws = _geometry(H, W, do_pool, has_proj)
    if not ((Hs == Hm or Hs == 1) and (Ws == Wm or Ws == 1)):
        raise ValueError("residual shapes do not broadcast (same error as PyTorch)")
    L, Lp, Lm = H * W, H * Wp, Hm * Wm

    # fold B samples per step -> lane extents multiples of 128 (dense stores)
    B = _fold_factor(N, L, Lm)
    n_pad = _round_up(max(N, B), B)
    steps = n_pad // B

    # pad channel counts to sublane (8) multiples -> all row slices aligned
    Pp = _round_up(P, 8)
    Cinp = _round_up(Cin, 8)
    C4p = _round_up(C4, 8)

    consts = _spatial_constants(H, W, do_pool, has_proj, B)

    # ---- tiny host-side parameter packing -------------------------------
    def pad_w(w, rows, cols):
        return jnp.pad(w, ((0, rows - w.shape[0]),
                           (0, cols - w.shape[1]))).astype(mxu_dtype)

    def pad_gb(g, b, rows):
        return (jnp.pad(g, ((0, rows - g.shape[0]), (0, 0)), constant_values=1.0),
                jnp.pad(b, ((0, rows - b.shape[0]), (0, 0))))

    w1 = pad_w(params["w1"], Pp, Cinp)
    w2s = jnp.pad(params["w2"], ((0, 0), (0, Pp - P), (0, Pp - P))
                  ).reshape(3 * Pp, Pp).astype(mxu_dtype)      # taps stacked on rows
    w3 = pad_w(params["w3"], C4p, Pp)
    g1, b1 = pad_gb(params["g1"], params["b1"], Pp)
    g2, b2 = pad_gb(params["g2"], params["b2"], Pp)
    g3, b3 = pad_gb(params["g3"], params["b3"], C4p)

    # ---- input: NCHW -> channels-first (C, batch*spatial) slab -----------
    xt = jnp.transpose(x_nchw.reshape(N, Cin, L), (1, 0, 2))   # (Cin, N, L)
    xt = jnp.pad(xt, ((0, Cinp - Cin), (0, n_pad - N), (0, 0)))
    xt = xt.reshape(Cinp, n_pad * L).astype(mxu_dtype)

    full = lambda shape: pl.BlockSpec(shape, lambda g: (0, 0))
    inputs = [xt, w1, g1, b1, w2s, g2, b2, w3, g3, b3]
    in_specs = [
        pl.BlockSpec((Cinp, B * L), lambda g: (0, g)),
        full((Pp, Cinp)), full((Pp, 1)), full((Pp, 1)),
        full((3 * Pp, Pp)), full((Pp, 1)), full((Pp, 1)),
        full((C4p, Pp)), full((C4p, 1)), full((C4p, 1)),
    ]
    if has_proj:
        ws = pad_w(params["ws"], C4p, Cinp)
        gs, bs = pad_gb(params["gs"], params["bs"], C4p)
        inputs += [ws, gs, bs]
        in_specs += [full((C4p, Cinp)), full((C4p, 1)), full((C4p, 1))]
    inputs += [consts["r1"], consts["e1"], consts["mdn"], consts["mup"],
               consts["mmain"], consts["mbord"], consts["r3"], consts["e3"],
               consts["msc"]]
    in_specs += [full((B * L, B)), full((B, B * L)), full((1, B * L)),
                 full((1, B * L)), full((B * L, B * Lm)), full((B, B * Lm)),
                 full((B * Lm, B)), full((B, B * Lm)), full((B * L, B * Lm))]

    kern = functools.partial(_bottleneck_kernel, L=L, Lp=Lp, Lm=Lm, W=W, Pp=Pp,
                             has_proj=has_proj, cdt=mxu_dtype)

    # VMEM budget (constants + double-buffered blocks); only raise the scoped
    # limit when actually needed (v7x has 64 MiB physical, 32 MiB default).
    blk_bytes = (Cinp * B * L) * xt.dtype.itemsize + (C4p * B * Lm) * 4
    const_bytes = sum(int(np.prod(a.shape)) * a.dtype.itemsize for a in inputs[1:])
    bytes_needed = 2 * (blk_bytes + const_bytes) + (4 << 20)
    cp_kwargs = dict(dimension_semantics=("parallel",))
    if bytes_needed > (30 << 20):
        cp_kwargs["vmem_limit_bytes"] = int(min(bytes_needed, 60 << 20))

    out = pl.pallas_call(
        kern,
        out_shape=jax.ShapeDtypeStruct((C4p, n_pad * Lm), x_nchw.dtype),
        grid=(steps,),
        in_specs=in_specs,
        out_specs=pl.BlockSpec((C4p, B * Lm), lambda g: (0, g)),
        compiler_params=pltpu.CompilerParams(**cp_kwargs),
    )(*inputs)

    out = out.reshape(C4p, n_pad, Lm)[:C4, :N]
    return jnp.transpose(out, (1, 0, 2)).reshape(N, C4, Hm, Wm)


# ---------------------------------------------------------------------------
# Pure-JAX reference (NCHW, mirrors the PyTorch forward; same param layout)
# ---------------------------------------------------------------------------
def _ref_inorm(y, g, b):
    mean = y.mean(axis=(2, 3), keepdims=True)
    var = jnp.square(y - mean).mean(axis=(2, 3), keepdims=True)
    yn = (y - mean) * jax.lax.rsqrt(var + EPS)
    return yn * g.reshape(1, -1, 1, 1) + b.reshape(1, -1, 1, 1)


def _ref_conv1x1(y, w):                          # w: (Cout, Cin)
    return jnp.einsum("nchw,dc->ndhw", y, w)


def _ref_conv31(y, wstack):                      # wstack: (3, Cout, Cin)
    yp = jnp.pad(y, ((0, 0), (0, 0), (1, 1), (1, 1)))
    H = y.shape[2]
    return sum(jnp.einsum("nchw,dc->ndhw", yp[:, :, k:k + H, :], wstack[k])
               for k in range(3))


def _ref_pool(y):                                # AvgPool2d((2,1), stride=2)
    Ho = (y.shape[2] - 2) // 2 + 1
    Wo = (y.shape[3] - 1) // 2 + 1
    return 0.5 * (y[:, :, 0:2 * Ho:2, 0:2 * Wo:2] + y[:, :, 1:2 * Ho:2, 0:2 * Wo:2])


def ref_forward(x, params, stride):
    Cin = x.shape[1]
    C4 = EXPANSION * params["w1"].shape[0]
    o = jax.nn.relu(_ref_inorm(_ref_conv1x1(x, params["w1"]), params["g1"], params["b1"]))
    o = jax.nn.relu(_ref_inorm(_ref_conv31(o, params["w2"]), params["g2"], params["b2"]))
    if stride != 1:
        o = _ref_pool(o)
    o = _ref_inorm(_ref_conv1x1(o, params["w3"]), params["g3"], params["b3"])
    if stride != 1 or Cin != C4:
        s = _ref_inorm(_ref_pool(_ref_conv1x1(x, params["ws"])), params["gs"], params["bs"])
    else:
        s = x
    return jax.nn.relu(o + s)


# ---------------------------------------------------------------------------
if __name__ == "__main__":
    key = jax.random.PRNGKey(0)

    def make_params(k, in_planes, planes):
        C4 = EXPANSION * planes
        ks = jax.random.split(k, 12)
        return {
            "w1": 0.3 * jax.random.normal(ks[0], (planes, in_planes), jnp.float32),
            "g1": 1.0 + 0.1 * jax.random.normal(ks[1], (planes, 1), jnp.float32),
            "b1": 0.1 * jax.random.normal(ks[2], (planes, 1), jnp.float32),
            "w2": 0.3 * jax.random.normal(ks[3], (3, planes, planes), jnp.float32),
            "g2": 1.0 + 0.1 * jax.random.normal(ks[4], (planes, 1), jnp.float32),
            "b2": 0.1 * jax.random.normal(ks[5], (planes, 1), jnp.float32),
            "w3": 0.3 * jax.random.normal(ks[6], (C4, planes), jnp.float32),
            "g3": 1.0 + 0.1 * jax.random.normal(ks[7], (C4, 1), jnp.float32),
            "b3": 0.1 * jax.random.normal(ks[8], (C4, 1), jnp.float32),
            "ws": 0.3 * jax.random.normal(ks[9], (C4, in_planes), jnp.float32),
            "gs": 1.0 + 0.1 * jax.random.normal(ks[10], (C4, 1), jnp.float32),
            "bs": 0.1 * jax.random.normal(ks[11], (C4, 1), jnp.float32),
        }

    k1, k2, k3, k4, k5 = jax.random.split(key, 5)
    N, in_planes, planes = 2, 8, 4
    C4 = EXPANSION * planes

    # Case 1: projection shortcut (stride=2), time-series input with W == 1.
    params = make_params(k1, in_planes, planes)
    x = jax.random.normal(k2, (N, in_planes, 16, 1), jnp.float32)
    out = jax.block_until_ready(bottleneck_ap_forward(x, params, stride=2))
    ref = jax.block_until_ready(ref_forward(x, params, 2))
    assert out.shape == ref.shape == (N, C4, 8, 2), (out.shape, ref.shape)
    err1 = float(jnp.max(jnp.abs(out - ref)))
    assert err1 < 2e-3, f"stride=2 max abs error too large: {err1}"

    # Case 2: identity shortcut (stride=1, in_planes == expansion*planes).
    params2 = make_params(k3, C4, planes)
    x2 = jax.random.normal(k4, (N, C4, 16, 1), jnp.float32)
    out2 = jax.block_until_ready(bottleneck_ap_forward(x2, params2, stride=1))
    ref2 = jax.block_until_ready(ref_forward(x2, params2, 1))
    assert out2.shape == ref2.shape == (N, C4, 16, 3), (out2.shape, ref2.shape)
    err2 = float(jnp.max(jnp.abs(out2 - ref2)))
    assert err2 < 2e-3, f"stride=1 max abs error too large: {err2}"

    # Case 3: projection shortcut with W > 1 (exercises interior pooling path).
    x3 = jax.random.normal(k5, (N, in_planes, 8, 2), jnp.float32)
    out3 = jax.block_until_ready(bottleneck_ap_forward(x3, params, stride=2))
    ref3 = jax.block_until_ready(ref_forward(x3, params, 2))
    assert out3.shape == ref3.shape == (N, C4, 4, 2), (out3.shape, ref3.shape)
    err3 = float(jnp.max(jnp.abs(out3 - ref3)))
    assert err3 < 2e-3, f"W=2 max abs error too large: {err3}"

    # bf16-MXU path (v6e/v7x): loose tolerance smoke test on case 1.
    out_bf = jax.block_until_ready(
        bottleneck_ap_forward(x, params, stride=2, mxu_dtype=jnp.bfloat16))
    rel = float(jnp.max(jnp.abs(out_bf - ref)) / (jnp.max(jnp.abs(ref)) + 1e-6))
    assert rel < 8e-2, f"bf16 relative error too large: {rel}"

    print("KERNEL_OK")
</pallas_src>

<mosaic_0001>
module attributes {stable_mosaic.version = 11 : i64} {
  func.func @_bottleneck_kernel(%arg0: i32, %arg1: memref<8x128xf32, #tpu.memory_space<vmem>>, %arg2: memref<8x8xf32, #tpu.memory_space<vmem>>, %arg3: memref<8x1xf32, #tpu.memory_space<vmem>>, %arg4: memref<8x1xf32, #tpu.memory_space<vmem>>, %arg5: memref<24x8xf32, #tpu.memory_space<vmem>>, %arg6: memref<8x1xf32, #tpu.memory_space<vmem>>, %arg7: memref<8x1xf32, #tpu.memory_space<vmem>>, %arg8: memref<16x8xf32, #tpu.memory_space<vmem>>, %arg9: memref<16x1xf32, #tpu.memory_space<vmem>>, %arg10: memref<16x1xf32, #tpu.memory_space<vmem>>, %arg11: memref<16x8xf32, #tpu.memory_space<vmem>>, %arg12: memref<16x1xf32, #tpu.memory_space<vmem>>, %arg13: memref<16x1xf32, #tpu.memory_space<vmem>>, %arg14: memref<128x8xf32, #tpu.memory_space<vmem>>, %arg15: memref<8x128xf32, #tpu.memory_space<vmem>>, %arg16: memref<1x128xf32, #tpu.memory_space<vmem>>, %arg17: memref<1x128xf32, #tpu.memory_space<vmem>>, %arg18: memref<128x128xf32, #tpu.memory_space<vmem>>, %arg19: memref<8x128xf32, #tpu.memory_space<vmem>>, %arg20: memref<128x8xf32, #tpu.memory_space<vmem>>, %arg21: memref<8x128xf32, #tpu.memory_space<vmem>>, %arg22: memref<128x128xf32, #tpu.memory_space<vmem>>, %arg23: memref<16x128xf32, #tpu.memory_space<vmem>>) attributes {dimension_semantics = [#tpu.dimension_semantics<parallel>], iteration_bounds = array<i64: 1>, scalar_prefetch = 0 : i64, scratch_operands = 0 : i64, tpu.core_type = #tpu.core_type<tc>, window_params = [{transform_indices = @transform_0, window_bounds = array<i64: 8, 128>}, {pipeline_mode = #tpu.pipeline_mode<synchronous>, transform_indices = @transform_1, window_bounds = array<i64: 8, 8>}, {pipeline_mode = #tpu.pipeline_mode<synchronous>, transform_indices = @transform_2, window_bounds = array<i64: 8, 1>}, {pipeline_mode = #tpu.pipeline_mode<synchronous>, transform_indices = @transform_3, window_bounds = array<i64: 8, 1>}, {pipeline_mode = #tpu.pipeline_mode<synchronous>, transform_indices = @transform_4, window_bounds = array<i64: 24, 8>}, {pipeline_mode = #tpu.pipeline_mode<synchronous>, transform_indices = @transform_5, window_bounds = array<i64: 8, 1>}, {pipeline_mode = #tpu.pipeline_mode<synchronous>, transform_indices = @transform_6, window_bounds = array<i64: 8, 1>}, {pipeline_mode = #tpu.pipeline_mode<synchronous>, transform_indices = @transform_7, window_bounds = array<i64: 16, 8>}, {pipeline_mode = #tpu.pipeline_mode<synchronous>, transform_indices = @transform_8, window_bounds = array<i64: 16, 1>}, {pipeline_mode = #tpu.pipeline_mode<synchronous>, transform_indices = @transform_9, window_bounds = array<i64: 16, 1>}, {pipeline_mode = #tpu.pipeline_mode<synchronous>, transform_indices = @transform_10, window_bounds = array<i64: 16, 8>}, {pipeline_mode = #tpu.pipeline_mode<synchronous>, transform_indices = @transform_11, window_bounds = array<i64: 16, 1>}, {pipeline_mode = #tpu.pipeline_mode<synchronous>, transform_indices = @transform_12, window_bounds = array<i64: 16, 1>}, {pipeline_mode = #tpu.pipeline_mode<synchronous>, transform_indices = @transform_13, window_bounds = array<i64: 128, 8>}, {pipeline_mode = #tpu.pipeline_mode<synchronous>, transform_indices = @transform_14, window_bounds = array<i64: 8, 128>}, {pipeline_mode = #tpu.pipeline_mode<synchronous>, transform_indices = @transform_15, window_bounds = array<i64: 1, 128>}, {pipeline_mode = #tpu.pipeline_mode<synchronous>, transform_indices = @transform_16, window_bounds = array<i64: 1, 128>}, {pipeline_mode = #tpu.pipeline_mode<synchronous>, transform_indices = @transform_17, window_bounds = array<i64: 128, 128>}, {pipeline_mode = #tpu.pipeline_mode<synchronous>, transform_indices = @transform_18, window_bounds = array<i64: 8, 128>}, {pipeline_mode = #tpu.pipeline_mode<synchronous>, transform_indices = @transform_19, window_bounds = array<i64: 128, 8>}, {pipeline_mode = #tpu.pipeline_mode<synchronous>, transform_indices = @transform_20, window_bounds = array<i64: 8, 128>}, {pipeline_mode = #tpu.pipeline_mode<synchronous>, transform_indices = @transform_21, window_bounds = array<i64: 128, 128>}, {transform_indices = @transform_22, window_bounds = array<i64: 16, 128>}]} {
    %c0 = arith.constant 0 : index
    %c0_0 = arith.constant 0 : index
    %0 = vector.load %arg1[%c0, %c0_0] : memref<8x128xf32, #tpu.memory_space<vmem>>, vector<8x128xf32>
    %c0_1 = arith.constant 0 : index
    %c0_2 = arith.constant 0 : index
    %1 = vector.load %arg2[%c0_1, %c0_2] : memref<8x8xf32, #tpu.memory_space<vmem>>, vector<8x8xf32>
    %cst = arith.constant dense<0.000000e+00> : vector<8x128xf32>
    %2 = tpu.matmul %1, %0, %cst {dimension_numbers = #tpu.dot_dimension_numbers<[1], [0], [0], [1], [0, 0, 1, 1], [], []>} : vector<8x8xf32>, vector<8x128xf32>, vector<8x128xf32> -> vector<8x128xf32>
    %c0_3 = arith.constant 0 : index
    %c0_4 = arith.constant 0 : index
    %3 = vector.load %arg3[%c0_3, %c0_4] : memref<8x1xf32, #tpu.memory_space<vmem>>, vector<8x1xf32>
    %c0_5 = arith.constant 0 : index
    %c0_6 = arith.constant 0 : index
    %4 = vector.load %arg4[%c0_5, %c0_6] : memref<8x1xf32, #tpu.memory_space<vmem>>, vector<8x1xf32>
    %c0_7 = arith.constant 0 : index
    %c0_8 = arith.constant 0 : index
    %5 = vector.load %arg14[%c0_7, %c0_8] : memref<128x8xf32, #tpu.memory_space<vmem>>, vector<128x8xf32>
    %cst_9 = arith.constant dense<0.000000e+00> : vector<8x8xf32>
    %6 = tpu.matmul %2, %5, %cst_9 {dimension_numbers = #tpu.dot_dimension_numbers<[1], [0], [0], [1], [0, 0, 1, 1], [], []>} : vector<8x128xf32>, vector<128x8xf32>, vector<8x8xf32> -> vector<8x8xf32>
    %7 = arith.mulf %2, %2 : vector<8x128xf32>
    %c0_10 = arith.constant 0 : index
    %c0_11 = arith.constant 0 : index
    %8 = vector.load %arg14[%c0_10, %c0_11] : memref<128x8xf32, #tpu.memory_space<vmem>>, vector<128x8xf32>
    %cst_12 = arith.constant dense<0.000000e+00> : vector<8x8xf32>
    %9 = tpu.matmul %7, %8, %cst_12 {dimension_numbers = #tpu.dot_dimension_numbers<[1], [0], [0], [1], [0, 0, 1, 1], [], []>} : vector<8x128xf32>, vector<128x8xf32>, vector<8x8xf32> -> vector<8x8xf32>
    %cst_13 = arith.constant 6.250000e-02 : f32
    %10 = vector.broadcast %cst_13 : f32 to vector<8x8xf32>
    %11 = arith.mulf %6, %10 : vector<8x8xf32>
    %cst_14 = arith.constant 6.250000e-02 : f32
    %12 = vector.broadcast %cst_14 : f32 to vector<8x8xf32>
    %13 = arith.mulf %9, %12 : vector<8x8xf32>
    %14 = arith.mulf %11, %11 : vector<8x8xf32>
    %15 = arith.subf %13, %14 : vector<8x8xf32>
    %cst_15 = arith.constant 0.000000e+00 : f32
    %16 = vector.broadcast %cst_15 : f32 to vector<8x8xf32>
    %17 = arith.maximumf %15, %16 : vector<8x8xf32>
    %cst_16 = arith.constant 9.99999974E-6 : f32
    %18 = vector.broadcast %cst_16 : f32 to vector<8x8xf32>
    %19 = arith.addf %17, %18 : vector<8x8xf32>
    %20 = math.rsqrt %19 : vector<8x8xf32>
    %21 = vector.broadcast %3 : vector<8x1xf32> to vector<8x8xf32>
    %22 = arith.mulf %20, %21 : vector<8x8xf32>
    %23 = arith.mulf %11, %22 : vector<8x8xf32>
    %24 = vector.broadcast %4 : vector<8x1xf32> to vector<8x8xf32>
    %25 = arith.subf %24, %23 : vector<8x8xf32>
    %c0_17 = arith.constant 0 : index
    %c0_18 = arith.constant 0 : index
    %26 = vector.load %arg15[%c0_17, %c0_18] : memref<8x128xf32, #tpu.memory_space<vmem>>, vector<8x128xf32>
    %cst_19 = arith.constant dense<0.000000e+00> : vector<8x128xf32>
    %27 = tpu.matmul %22, %26, %cst_19 {dimension_numbers = #tpu.dot_dimension_numbers<[1], [0], [0], [1], [0, 0, 1, 1], [], []>} : vector<8x8xf32>, vector<8x128xf32>, vector<8x128xf32> -> vector<8x128xf32>
    %28 = arith.mulf %2, %27 : vector<8x128xf32>
    %c0_20 = arith.constant 0 : index
    %c0_21 = arith.constant 0 : index
    %29 = vector.load %arg15[%c0_20, %c0_21] : memref<8x128xf32, #tpu.memory_space<vmem>>, vector<8x128xf32>
    %cst_22 = arith.constant dense<0.000000e+00> : vector<8x128xf32>
    %30 = tpu.matmul %25, %29, %cst_22 {dimension_numbers = #tpu.dot_dimension_numbers<[1], [0], [0], [1], [0, 0, 1, 1], [], []>} : vector<8x8xf32>, vector<8x128xf32>, vector<8x128xf32> -> vector<8x128xf32>
    %31 = arith.addf %28, %30 : vector<8x128xf32>
    %cst_23 = arith.constant 0.000000e+00 : f32
    %32 = vector.broadcast %cst_23 : f32 to vector<8x128xf32>
    %33 = arith.maximumf %31, %32 : vector<8x128xf32>
    %c0_24 = arith.constant 0 : index
    %c0_25 = arith.constant 0 : index
    %34 = vector.load %arg5[%c0_24, %c0_25] : memref<24x8xf32, #tpu.memory_space<vmem>>, vector<24x8xf32>
    %cst_26 = arith.constant dense<0.000000e+00> : vector<24x128xf32>
    %35 = tpu.matmul %34, %33, %cst_26 {dimension_numbers = #tpu.dot_dimension_numbers<[1], [0], [0], [1], [0, 0, 1, 1], [], []>} : vector<24x8xf32>, vector<8x128xf32>, vector<24x128xf32> -> vector<24x128xf32>
    %36 = vector.extract_strided_slice %35 {offsets = [0, 0], sizes = [8, 128], strides = [1, 1]} : vector<24x128xf32> to vector<8x128xf32>
    %37 = vector.extract_strided_slice %35 {offsets = [8, 0], sizes = [8, 128], strides = [1, 1]} : vector<24x128xf32> to vector<8x128xf32>
    %38 = vector.extract_strided_slice %35 {offsets = [16, 0], sizes = [8, 128], strides = [1, 1]} : vector<24x128xf32> to vector<8x128xf32>
    %c1_i32 = arith.constant 1 : i32
    %39 = tpu.dynamic_rotate %36 by %c1_i32 dim 1 : vector<8x128xf32>, i32 -> vector<8x128xf32>
    %c0_27 = arith.constant 0 : index
    %c0_28 = arith.constant 0 : index
    %40 = vector.load %arg16[%c0_27, %c0_28] : memref<1x128xf32, #tpu.memory_space<vmem>>, vector<1x128xf32>
    %41 = vector.broadcast %40 : vector<1x128xf32> to vector<8x128xf32>
    %42 = arith.mulf %39, %41 : vector<8x128xf32>
    %43 = arith.addf %42, %37 : vector<8x128xf32>
    %c127_i32 = arith.constant 127 : i32
    %44 = tpu.dynamic_rotate %38 by %c127_i32 dim 1 : vector<8x128xf32>, i32 -> vector<8x128xf32>
    %c0_29 = arith.constant 0 : index
    %c0_30 = arith.constant 0 : index
    %45 = vector.load %arg17[%c0_29, %c0_30] : memref<1x128xf32, #tpu.memory_space<vmem>>, vector<1x128xf32>
    %46 = vector.broadcast %45 : vector<1x128xf32> to vector<8x128xf32>
    %47 = arith.mulf %44, %46 : vector<8x128xf32>
    %48 = arith.addf %43, %47 : vector<8x128xf32>
    %c0_31 = arith.constant 0 : index
    %c0_32 = arith.constant 0 : index
    %49 = vector.load %arg6[%c0_31, %c0_32] : memref<8x1xf32, #tpu.memory_space<vmem>>, vector<8x1xf32>
    %c0_33 = arith.constant 0 : index
    %c0_34 = arith.constant 0 : index
    %50 = vector.load %arg7[%c0_33, %c0_34] : memref<8x1xf32, #tpu.memory_space<vmem>>, vector<8x1xf32>
    %c0_35 = arith.constant 0 : index
    %c0_36 = arith.constant 0 : index
    %51 = vector.load %arg14[%c0_35, %c0_36] : memref<128x8xf32, #tpu.memory_space<vmem>>, vector<128x8xf32>
    %cst_37 = arith.constant dense<0.000000e+00> : vector<8x8xf32>
    %52 = tpu.matmul %48, %51, %cst_37 {dimension_numbers = #tpu.dot_dimension_numbers<[1], [0], [0], [1], [0, 0, 1, 1], [], []>} : vector<8x128xf32>, vector<128x8xf32>, vector<8x8xf32> -> vector<8x8xf32>
    %53 = arith.mulf %48, %48 : vector<8x128xf32>
    %c0_38 = arith.constant 0 : index
    %c0_39 = arith.constant 0 : index
    %54 = vector.load %arg14[%c0_38, %c0_39] : memref<128x8xf32, #tpu.memory_space<vmem>>, vector<128x8xf32>
    %cst_40 = arith.constant dense<0.000000e+00> : vector<8x8xf32>
    %55 = tpu.matmul %53, %54, %cst_40 {dimension_numbers = #tpu.dot_dimension_numbers<[1], [0], [0], [1], [0, 0, 1, 1], [], []>} : vector<8x128xf32>, vector<128x8xf32>, vector<8x8xf32> -> vector<8x8xf32>
    %cst_41 = arith.constant 0.020833334 : f32
    %56 = vector.broadcast %cst_41 : f32 to vector<8x8xf32>
    %57 = arith.mulf %52, %56 : vector<8x8xf32>
    %cst_42 = arith.constant 0.020833334 : f32
    %58 = vector.broadcast %cst_42 : f32 to vector<8x8xf32>
    %59 = arith.mulf %55, %58 : vector<8x8xf32>
    %60 = arith.mulf %57, %57 : vector<8x8xf32>
    %61 = arith.subf %59, %60 : vector<8x8xf32>
    %cst_43 = arith.constant 0.000000e+00 : f32
    %62 = vector.broadcast %cst_43 : f32 to vector<8x8xf32>
    %63 = arith.maximumf %61, %62 : vector<8x8xf32>
    %cst_44 = arith.constant 9.99999974E-6 : f32
    %64 = vector.broadcast %cst_44 : f32 to vector<8x8xf32>
    %65 = arith.addf %63, %64 : vector<8x8xf32>
    %66 = math.rsqrt %65 : vector<8x8xf32>
    %67 = vector.broadcast %49 : vector<8x1xf32> to vector<8x8xf32>
    %68 = arith.mulf %66, %67 : vector<8x8xf32>
    %69 = arith.mulf %57, %68 : vector<8x8xf32>
    %70 = vector.broadcast %50 : vector<8x1xf32> to vector<8x8xf32>
    %71 = arith.subf %70, %69 : vector<8x8xf32>
    %c0_45 = arith.constant 0 : index
    %c0_46 = arith.constant 0 : index
    %72 = vector.load %arg15[%c0_45, %c0_46] : memref<8x128xf32, #tpu.memory_space<vmem>>, vector<8x128xf32>
    %cst_47 = arith.constant dense<0.000000e+00> : vector<8x128xf32>
    %73 = tpu.matmul %68, %72, %cst_47 {dimension_numbers = #tpu.dot_dimension_numbers<[1], [0], [0], [1], [0, 0, 1, 1], [], []>} : vector<8x8xf32>, vector<8x128xf32>, vector<8x128xf32> -> vector<8x128xf32>
    %74 = arith.mulf %48, %73 : vector<8x128xf32>
    %c0_48 = arith.constant 0 : index
    %c0_49 = arith.constant 0 : index
    %75 = vector.load %arg15[%c0_48, %c0_49] : memref<8x128xf32, #tpu.memory_space<vmem>>, vector<8x128xf32>
    %cst_50 = arith.constant dense<0.000000e+00> : vector<8x128xf32>
    %76 = tpu.matmul %71, %75, %cst_50 {dimension_numbers = #tpu.dot_dimension_numbers<[1], [0], [0], [1], [0, 0, 1, 1], [], []>} : vector<8x8xf32>, vector<8x128xf32>, vector<8x128xf32> -> vector<8x128xf32>
    %77 = arith.addf %74, %76 : vector<8x128xf32>
    %cst_51 = arith.constant 0.000000e+00 : f32
    %78 = vector.broadcast %cst_51 : f32 to vector<8x128xf32>
    %79 = arith.maximumf %77, %78 : vector<8x128xf32>
    %cst_52 = arith.constant 0.000000e+00 : f32
    %80 = vector.broadcast %cst_52 : f32 to vector<8x8xf32>
    %81 = arith.maximumf %71, %80 : vector<8x8xf32>
    %c0_53 = arith.constant 0 : index
    %c0_54 = arith.constant 0 : index
    %82 = vector.load %arg18[%c0_53, %c0_54] : memref<128x128xf32, #tpu.memory_space<vmem>>, vector<128x128xf32>
    %cst_55 = arith.constant dense<0.000000e+00> : vector<8x128xf32>
    %83 = tpu.matmul %79, %82, %cst_55 {dimension_numbers = #tpu.dot_dimension_numbers<[1], [0], [0], [1], [0, 0, 1, 1], [], []>} : vector<8x128xf32>, vector<128x128xf32>, vector<8x128xf32> -> vector<8x128xf32>
    %c0_56 = arith.constant 0 : index
    %c0_57 = arith.constant 0 : index
    %84 = vector.load %arg19[%c0_56, %c0_57] : memref<8x128xf32, #tpu.memory_space<vmem>>, vector<8x128xf32>
    %cst_58 = arith.constant dense<0.000000e+00> : vector<8x128xf32>
    %85 = tpu.matmul %81, %84, %cst_58 {dimension_numbers = #tpu.dot_dimension_numbers<[1], [0], [0], [1], [0, 0, 1, 1], [], []>} : vector<8x8xf32>, vector<8x128xf32>, vector<8x128xf32> -> vector<8x128xf32>
    %86 = arith.addf %83, %85 : vector<8x128xf32>
    %c0_59 = arith.constant 0 : index
    %c0_60 = arith.constant 0 : index
    %87 = vector.load %arg8[%c0_59, %c0_60] : memref<16x8xf32, #tpu.memory_space<vmem>>, vector<16x8xf32>
    %cst_61 = arith.constant dense<0.000000e+00> : vector<16x128xf32>
    %88 = tpu.matmul %87, %86, %cst_61 {dimension_numbers = #tpu.dot_dimension_numbers<[1], [0], [0], [1], [0, 0, 1, 1], [], []>} : vector<16x8xf32>, vector<8x128xf32>, vector<16x128xf32> -> vector<16x128xf32>
    %c0_62 = arith.constant 0 : index
    %c0_63 = arith.constant 0 : index
    %89 = vector.load %arg9[%c0_62, %c0_63] : memref<16x1xf32, #tpu.memory_space<vmem>>, vector<16x1xf32>
    %c0_64 = arith.constant 0 : index
    %c0_65 = arith.constant 0 : index
    %90 = vector.load %arg10[%c0_64, %c0_65] : memref<16x1xf32, #tpu.memory_space<vmem>>, vector<16x1xf32>
    %c0_66 = arith.constant 0 : index
    %c0_67 = arith.constant 0 : index
    %91 = vector.load %arg20[%c0_66, %c0_67] : memref<128x8xf32, #tpu.memory_space<vmem>>, vector<128x8xf32>
    %cst_68 = arith.constant dense<0.000000e+00> : vector<16x8xf32>
    %92 = tpu.matmul %88, %91, %cst_68 {dimension_numbers = #tpu.dot_dimension_numbers<[1], [0], [0], [1], [0, 0, 1, 1], [], []>} : vector<16x128xf32>, vector<128x8xf32>, vector<16x8xf32> -> vector<16x8xf32>
    %93 = arith.mulf %88, %88 : vector<16x128xf32>
    %c0_69 = arith.constant 0 : index
    %c0_70 = arith.constant 0 : index
    %94 = vector.load %arg20[%c0_69, %c0_70] : memref<128x8xf32, #tpu.memory_space<vmem>>, vector<128x8xf32>
    %cst_71 = arith.constant dense<0.000000e+00> : vector<16x8xf32>
    %95 = tpu.matmul %93, %94, %cst_71 {dimension_numbers = #tpu.dot_dimension_numbers<[1], [0], [0], [1], [0, 0, 1, 1], [], []>} : vector<16x128xf32>, vector<128x8xf32>, vector<16x8xf32> -> vector<16x8xf32>
    %cst_72 = arith.constant 6.250000e-02 : f32
    %96 = vector.broadcast %cst_72 : f32 to vector<16x8xf32>
    %97 = arith.mulf %92, %96 : vector<16x8xf32>
    %cst_73 = arith.constant 6.250000e-02 : f32
    %98 = vector.broadcast %cst_73 : f32 to vector<16x8xf32>
    %99 = arith.mulf %95, %98 : vector<16x8xf32>
    %100 = arith.mulf %97, %97 : vector<16x8xf32>
    %101 = arith.subf %99, %100 : vector<16x8xf32>
    %cst_74 = arith.constant 0.000000e+00 : f32
    %102 = vector.broadcast %cst_74 : f32 to vector<16x8xf32>
    %103 = arith.maximumf %101, %102 : vector<16x8xf32>
    %cst_75 = arith.constant 9.99999974E-6 : f32
    %104 = vector.broadcast %cst_75 : f32 to vector<16x8xf32>
    %105 = arith.addf %103, %104 : vector<16x8xf32>
    %106 = math.rsqrt %105 : vector<16x8xf32>
    %107 = vector.broadcast %89 : vector<16x1xf32> to vector<16x8xf32>
    %108 = arith.mulf %106, %107 : vector<16x8xf32>
    %109 = arith.mulf %97, %108 : vector<16x8xf32>
    %110 = vector.broadcast %90 : vector<16x1xf32> to vector<16x8xf32>
    %111 = arith.subf %110, %109 : vector<16x8xf32>
    %c0_76 = arith.constant 0 : index
    %c0_77 = arith.constant 0 : index
    %112 = vector.load %arg21[%c0_76, %c0_77] : memref<8x128xf32, #tpu.memory_space<vmem>>, vector<8x128xf32>
    %cst_78 = arith.constant dense<0.000000e+00> : vector<16x128xf32>
    %113 = tpu.matmul %108, %112, %cst_78 {dimension_numbers = #tpu.dot_dimension_numbers<[1], [0], [0], [1], [0, 0, 1, 1], [], []>} : vector<16x8xf32>, vector<8x128xf32>, vector<16x128xf32> -> vector<16x128xf32>
    %114 = arith.mulf %88, %113 : vector<16x128xf32>
    %c0_79 = arith.constant 0 : index
    %c0_80 = arith.constant 0 : index
    %115 = vector.load %arg21[%c0_79, %c0_80] : memref<8x128xf32, #tpu.memory_space<vmem>>, vector<8x128xf32>
    %cst_81 = arith.constant dense<0.000000e+00> : vector<16x128xf32>
    %116 = tpu.matmul %111, %115, %cst_81 {dimension_numbers = #tpu.dot_dimension_numbers<[1], [0], [0], [1], [0, 0, 1, 1], [], []>} : vector<16x8xf32>, vector<8x128xf32>, vector<16x128xf32> -> vector<16x128xf32>
    %117 = arith.addf %114, %116 : vector<16x128xf32>
    %c0_82 = arith.constant 0 : index
    %c0_83 = arith.constant 0 : index
    %118 = vector.load %arg11[%c0_82, %c0_83] : memref<16x8xf32, #tpu.memory_space<vmem>>, vector<16x8xf32>
    %cst_84 = arith.constant dense<0.000000e+00> : vector<16x128xf32>
    %119 = tpu.matmul %118, %0, %cst_84 {dimension_numbers = #tpu.dot_dimension_numbers<[1], [0], [0], [1], [0, 0, 1, 1], [], []>} : vector<16x8xf32>, vector<8x128xf32>, vector<16x128xf32> -> vector<16x128xf32>
    %c0_85 = arith.constant 0 : index
    %c0_86 = arith.constant 0 : index
    %120 = vector.load %arg22[%c0_85, %c0_86] : memref<128x128xf32, #tpu.memory_space<vmem>>, vector<128x128xf32>
    %cst_87 = arith.constant dense<0.000000e+00> : vector<16x128xf32>
    %121 = tpu.matmul %119, %120, %cst_87 {dimension_numbers = #tpu.dot_dimension_numbers<[1], [0], [0], [1], [0, 0, 1, 1], [], []>} : vector<16x128xf32>, vector<128x128xf32>, vector<16x128xf32> -> vector<16x128xf32>
    %c0_88 = arith.constant 0 : index
    %c0_89 = arith.constant 0 : index
    %122 = vector.load %arg12[%c0_88, %c0_89] : memref<16x1xf32, #tpu.memory_space<vmem>>, vector<16x1xf32>
    %c0_90 = arith.constant 0 : index
    %c0_91 = arith.constant 0 : index
    %123 = vector.load %arg13[%c0_90, %c0_91] : memref<16x1xf32, #tpu.memory_space<vmem>>, vector<16x1xf32>
    %c0_92 = arith.constant 0 : index
    %c0_93 = arith.constant 0 : index
    %124 = vector.load %arg20[%c0_92, %c0_93] : memref<128x8xf32, #tpu.memory_space<vmem>>, vector<128x8xf32>
    %cst_94 = arith.constant dense<0.000000e+00> : vector<16x8xf32>
    %125 = tpu.matmul %121, %124, %cst_94 {dimension_numbers = #tpu.dot_dimension_numbers<[1], [0], [0], [1], [0, 0, 1, 1], [], []>} : vector<16x128xf32>, vector<128x8xf32>, vector<16x8xf32> -> vector<16x8xf32>
    %126 = arith.mulf %121, %121 : vector<16x128xf32>
    %c0_95 = arith.constant 0 : index
    %c0_96 = arith.constant 0 : index
    %127 = vector.load %arg20[%c0_95, %c0_96] : memref<128x8xf32, #tpu.memory_space<vmem>>, vector<128x8xf32>
    %cst_97 = arith.constant dense<0.000000e+00> : vector<16x8xf32>
    %128 = tpu.matmul %126, %127, %cst_97 {dimension_numbers = #tpu.dot_dimension_numbers<[1], [0], [0], [1], [0, 0, 1, 1], [], []>} : vector<16x128xf32>, vector<128x8xf32>, vector<16x8xf32> -> vector<16x8xf32>
    %cst_98 = arith.constant 6.250000e-02 : f32
    %129 = vector.broadcast %cst_98 : f32 to vector<16x8xf32>
    %130 = arith.mulf %125, %129 : vector<16x8xf32>
    %cst_99 = arith.constant 6.250000e-02 : f32
    %131 = vector.broadcast %cst_99 : f32 to vector<16x8xf32>
    %132 = arith.mulf %128, %131 : vector<16x8xf32>
    %133 = arith.mulf %130, %130 : vector<16x8xf32>
    %134 = arith.subf %132, %133 : vector<16x8xf32>
    %cst_100 = arith.constant 0.000000e+00 : f32
    %135 = vector.broadcast %cst_100 : f32 to vector<16x8xf32>
    %136 = arith.maximumf %134, %135 : vector<16x8xf32>
    %cst_101 = arith.constant 9.99999974E-6 : f32
    %137 = vector.broadcast %cst_101 : f32 to vector<16x8xf32>
    %138 = arith.addf %136, %137 : vector<16x8xf32>
    %139 = math.rsqrt %138 : vector<16x8xf32>
    %140 = vector.broadcast %122 : vector<16x1xf32> to vector<16x8xf32>
    %141 = arith.mulf %139, %140 : vector<16x8xf32>
    %142 = arith.mulf %130, %141 : vector<16x8xf32>
    %143 = vector.broadcast %123 : vector<16x1xf32> to vector<16x8xf32>
    %144 = arith.subf %143, %142 : vector<16x8xf32>
    %c0_102 = arith.constant 0 : index
    %c0_103 = arith.constant 0 : index
    %145 = vector.load %arg21[%c0_102, %c0_103] : memref<8x128xf32, #tpu.memory_space<vmem>>, vector<8x128xf32>
    %cst_104 = arith.constant dense<0.000000e+00> : vector<16x128xf32>
    %146 = tpu.matmul %141, %145, %cst_104 {dimension_numbers = #tpu.dot_dimension_numbers<[1], [0], [0], [1], [0, 0, 1, 1], [], []>} : vector<16x8xf32>, vector<8x128xf32>, vector<16x128xf32> -> vector<16x128xf32>
    %147 = arith.mulf %121, %146 : vector<16x128xf32>
    %c0_105 = arith.constant 0 : index
    %c0_106 = arith.constant 0 : index
    %148 = vector.load %arg21[%c0_105, %c0_106] : memref<8x128xf32, #tpu.memory_space<vmem>>, vector<8x128xf32>
    %cst_107 = arith.constant dense<0.000000e+00> : vector<16x128xf32>
    %149 = tpu.matmul %144, %148, %cst_107 {dimension_numbers = #tpu.dot_dimension_numbers<[1], [0], [0], [1], [0, 0, 1, 1], [], []>} : vector<16x8xf32>, vector<8x128xf32>, vector<16x128xf32> -> vector<16x128xf32>
    %150 = arith.addf %147, %149 : vector<16x128xf32>
    %151 = arith.addf %117, %150 : vector<16x128xf32>
    %cst_108 = arith.constant 0.000000e+00 : f32
    %152 = vector.broadcast %cst_108 : f32 to vector<16x128xf32>
    %153 = arith.maximumf %151, %152 : vector<16x128xf32>
    %c0_109 = arith.constant 0 : index
    %c0_110 = arith.constant 0 : index
    %154 = vector.load %arg23[%c0_109, %c0_110] : memref<16x128xf32, #tpu.memory_space<vmem>>, vector<16x128xf32>
    tpu.vector_store %arg23[%c0_109, %c0_110], %153 {strides = array<i32>} : memref<16x128xf32, #tpu.memory_space<vmem>>, vector<16x128xf32>,
    return
  }
  func.func @transform_0(%arg0: i32) -> (i32, i32) {
    %c0_i32 = arith.constant 0 : i32
    %c0_i32_0 = arith.constant 0 : i32
    return %c0_i32, %arg0 : i32, i32
  }
  func.func @transform_1(%arg0: i32) -> (i32, i32) {
    %c0_i32 = arith.constant 0 : i32
    %c0_i32_0 = arith.constant 0 : i32
    %c0_i32_1 = arith.constant 0 : i32
    return %c0_i32, %c0_i32_0 : i32, i32
  }
  func.func @transform_2(%arg0: i32) -> (i32, i32) {
    %c0_i32 = arith.constant 0 : i32
    %c0_i32_0 = arith.constant 0 : i32
    %c0_i32_1 = arith.constant 0 : i32
    return %c0_i32, %c0_i32_0 : i32, i32
  }
  func.func @transform_3(%arg0: i32) -> (i32, i32) {
    %c0_i32 = arith.constant 0 : i32
    %c0_i32_0 = arith.constant 0 : i32
    %c0_i32_1 = arith.constant 0 : i32
    return %c0_i32, %c0_i32_0 : i32, i32
  }
  func.func @transform_4(%arg0: i32) -> (i32, i32) {
    %c0_i32 = arith.constant 0 : i32
    %c0_i32_0 = arith.constant 0 : i32
    %c0_i32_1 = arith.constant 0 : i32
    return %c0_i32, %c0_i32_0 : i32, i32
  }
  func.func @transform_5(%arg0: i32) -> (i32, i32) {
    %c0_i32 = arith.constant 0 : i32
    %c0_i32_0 = arith.constant 0 : i32
    %c0_i32_1 = arith.constant 0 : i32
    return %c0_i32, %c0_i32_0 : i32, i32
  }
  func.func @transform_6(%arg0: i32) -> (i32, i32) {
    %c0_i32 = arith.constant 0 : i32
    %c0_i32_0 = arith.constant 0 : i32
    %c0_i32_1 = arith.constant 0 : i32
    return %c0_i32, %c0_i32_0 : i32, i32
  }
  func.func @transform_7(%arg0: i32) -> (i32, i32) {
    %c0_i32 = arith.constant 0 : i32
    %c0_i32_0 = arith.constant 0 : i32
    %c0_i32_1 = arith.constant 0 : i32
    return %c0_i32, %c0_i32_0 : i32, i32
  }
  func.func @transform_8(%arg0: i32) -> (i32, i32) {
    %c0_i32 = arith.constant 0 : i32
    %c0_i32_0 = arith.constant 0 : i32
    %c0_i32_1 = arith.constant 0 : i32
    return %c0_i32, %c0_i32_0 : i32, i32
  }
  func.func @transform_9(%arg0: i32) -> (i32, i32) {
    %c0_i32 = arith.constant 0 : i32
    %c0_i32_0 = arith.constant 0 : i32
    %c0_i32_1 = arith.constant 0 : i32
    return %c0_i32, %c0_i32_0 : i32, i32
  }
  func.func @transform_10(%arg0: i32) -> (i32, i32) {
    %c0_i32 = arith.constant 0 : i32
    %c0_i32_0 = arith.constant 0 : i32
    %c0_i32_1 = arith.constant 0 : i32
    return %c0_i32, %c0_i32_0 : i32, i32
  }
  func.func @transform_11(%arg0: i32) -> (i32, i32) {
    %c0_i32 = arith.constant 0 : i32
    %c0_i32_0 = arith.constant 0 : i32
    %c0_i32_1 = arith.constant 0 : i32
    return %c0_i32, %c0_i32_0 : i32, i32
  }
  func.func @transform_12(%arg0: i32) -> (i32, i32) {
    %c0_i32 = arith.constant 0 : i32
    %c0_i32_0 = arith.constant 0 : i32
    %c0_i32_1 = arith.constant 0 : i32
    return %c0_i32, %c0_i32_0 : i32, i32
  }
  func.func @transform_13(%arg0: i32) -> (i32, i32) {
    %c0_i32 = arith.constant 0 : i32
    %c0_i32_0 = arith.constant 0 : i32
    %c0_i32_1 = arith.constant 0 : i32
    return %c0_i32, %c0_i32_0 : i32, i32
  }
  func.func @transform_14(%arg0: i32) -> (i32, i32) {
    %c0_i32 = arith.constant 0 : i32
    %c0_i32_0 = arith.constant 0 : i32
    %c0_i32_1 = arith.constant 0 : i32
    return %c0_i32, %c0_i32_0 : i32, i32
  }
  func.func @transform_15(%arg0: i32) -> (i32, i32) {
    %c0_i32 = arith.constant 0 : i32
    %c0_i32_0 = arith.constant 0 : i32
    %c0_i32_1 = arith.constant 0 : i32
    return %c0_i32, %c0_i32_0 : i32, i32
  }
  func.func @transform_16(%arg0: i32) -> (i32, i32) {
    %c0_i32 = arith.constant 0 : i32
    %c0_i32_0 = arith.constant 0 : i32
    %c0_i32_1 = arith.constant 0 : i32
    return %c0_i32, %c0_i32_0 : i32, i32
  }
  func.func @transform_17(%arg0: i32) -> (i32, i32) {
    %c0_i32 = arith.constant 0 : i32
    %c0_i32_0 = arith.constant 0 : i32
    %c0_i32_1 = arith.constant 0 : i32
    return %c0_i32, %c0_i32_0 : i32, i32
  }
  func.func @transform_18(%arg0: i32) -> (i32, i32) {
    %c0_i32 = arith.constant 0 : i32
    %c0_i32_0 = arith.constant 0 : i32
    %c0_i32_1 = arith.constant 0 : i32
    return %c0_i32, %c0_i32_0 : i32, i32
  }
  func.func @transform_19(%arg0: i32) -> (i32, i32) {
    %c0_i32 = arith.constant 0 : i32
    %c0_i32_0 = arith.constant 0 : i32
    %c0_i32_1 = arith.constant 0 : i32
    return %c0_i32, %c0_i32_0 : i32, i32
  }
  func.func @transform_20(%arg0: i32) -> (i32, i32) {
    %c0_i32 = arith.constant 0 : i32
    %c0_i32_0 = arith.constant 0 : i32
    %c0_i32_1 = arith.constant 0 : i32
    return %c0_i32, %c0_i32_0 : i32, i32
  }
  func.func @transform_21(%arg0: i32) -> (i32, i32) {
    %c0_i32 = arith.constant 0 : i32
    %c0_i32_0 = arith.constant 0 : i32
    %c0_i32_1 = arith.constant 0 : i32
    return %c0_i32, %c0_i32_0 : i32, i32
  }
  func.func @transform_22(%arg0: i32) -> (i32, i32) {
    %c0_i32 = arith.constant 0 : i32
    %c0_i32_0 = arith.constant 0 : i32
    return %c0_i32, %arg0 : i32, i32
  }
}

</mosaic_0001>

<bundles_post_ra>
// kernel: tpu_custom_call.1
= control target key start
LH: loop header
LB: loop body
LE: loop exit
PB: predicated region body
PF: predicated region fallthrough
CT: control target
= control target key end

     0   :  { %s3623_s0 = inlined_call_operand.vmem [shape: f32[8,128], index: 0, kind: input, shape index: {}]   ;;  %s3624_s1 = inlined_call_operand.vmem [shape: f32[8,8], index: 1, kind: input, shape index: {}]   ;;  %s3625_s2 = inlined_call_operand.vmem [shape: f32[8,1], index: 2, kind: input, shape index: {}]   ;;  %s3626_s3 = inlined_call_operand.vmem [shape: f32[8,1], index: 3, kind: input, shape index: {}]   ;;  %s3627_s4 = inlined_call_operand.vmem [shape: f32[24,8], index: 4, kind: input, shape index: {}]   ;;  %s3628_s5 = inlined_call_operand.vmem [shape: f32[8,1], index: 5, kind: input, shape index: {}]   ;;  %s3629_s6 = inlined_call_operand.vmem [shape: f32[8,1], index: 6, kind: input, shape index: {}]   ;;  %s3630_s7 = inlined_call_operand.vmem [shape: f32[16,8], index: 7, kind: input, shape index: {}]   ;;  %s3631_s8 = inlined_call_operand.vmem [shape: f32[16,1], index: 8, kind: input, shape index: {}]   ;;  %s3632_s9 = inlined_call_operand.vmem [shape: f32[16,1], index: 9, kind: input, shape index: {}]   ;;  %s3633_s10 = inlined_call_operand.vmem [shape: f32[16,8], index: 10, kind: input, shape index: {}]   ;;  %s3634_s11 = inlined_call_operand.vmem [shape: f32[16,1], index: 11, kind: input, shape index: {}]   ;;  %s3635_s12 = inlined_call_operand.vmem [shape: f32[16,1], index: 12, kind: input, shape index: {}]   ;;  %s3636_s13 = inlined_call_operand.vmem [shape: f32[128,8], index: 13, kind: input, shape index: {}]   ;;  %s3637_s14 = inlined_call_operand.vmem [shape: f32[8,128], index: 14, kind: input, shape index: {}]   ;;  %s3638_s15 = inlined_call_operand.vmem [shape: f32[1,128], index: 15, kind: input, shape index: {}]   ;;  %s3639_s16 = inlined_call_operand.vmem [shape: f32[1,128], index: 16, kind: input, shape index: {}]   ;;  %s3640_s17 = inlined_call_operand.vmem [shape: f32[128,128], index: 17, kind: input, shape index: {}]   ;;  %s3641_s18 = inlined_call_operand.vmem [shape: f32[8,128], index: 18, kind: input, shape index: {}]   ;;  %s3642_s19 = inlined_call_operand.vmem [shape: f32[128,8], index: 19, kind: input, shape index: {}]   ;;  %s3643_s20 = inlined_call_operand.vmem [shape: f32[8,128], index: 20, kind: input, shape index: {}]   ;;  %s3644_s21 = inlined_call_operand.vmem [shape: f32[128,128], index: 21, kind: input, shape index: {}]   ;;  %s3645_s22 = inlined_call_operand.hbm [shape: f32[16,128], index: 22, kind: output, shape index: {}]  }
   0x1   :  { %3648 = sst [smem:[#allocation5_spill]] %s3623_s0 }
   0x2   :  { %3649 = sst [smem:[#allocation6_spill]] %s3624_s1 }
   0x3   :  { %3650 = sst [smem:[#allocation7_spill]] %s3625_s2 }
   0x4   :  { %3651 = sst [smem:[#allocation8_spill]] %s3626_s3 }
   0x5   :  { %3652 = sst [smem:[#allocation9_spill]] %s3627_s4 }
   0x6   :  { %3653 = sst [smem:[#allocation10_spill]] %s3628_s5 }
   0x7   :  { %3654 = sst [smem:[#allocation11_spill]] %s3629_s6 }
   0x8   :  { %s3655_s29 = sld [smem:[#allocation5_spill]]  ;;  %vm74_vm0 = vcmask 64512   ;;  %v2916_v2 = vld [vmem:[%s3636_s13 + $0x78] sm:$0xff]  ;;  %v2782_v3 = vmov 0.0   ;;  %vm2783_vm1 = vmmov 0   ;;  %v2926_v4 = vld [vmem:[%s3636_s13 + $0x70] sm:$0xff] }
   0x9   :  { %s3656_s0 = sld [smem:[#allocation6_spill]]  ;;  %2316 = vmatprep.subr.mxu0 %v2782_v3  ;;  %2318 = vmatprep.mubr.msk.f32.mxu0 %vm2783_vm1, %v2782_v3  ;;  %v2935_v5 = vld [vmem:[%s3636_s13 + $0x68] sm:$0xff] }
   0xa   :  { %2321 = vmatprep.subr.mxu1 %v2782_v3 }
   0xb   :  { %2322 = vmatpush3.msra.mxu1 %v2916_v2 }
   0xc   :  { %2323 = vmatprep.subr.mxu1 %v2782_v3 }
   0xd   :  { %2324 = vmatpush3.msra.mxu1 %v2926_v4 }
   0xe   :  { %v2908_v0 = vld [vmem:[%s3655_s29] sm:$0xff] }
   0xf   :  { %v73_v1 = vld [vmem:[%s3656_s0] sm:$0xff]  ;;  %2317 = vmatpush3.msra.mxu0 %v2908_v0 }
  0x10   :  { %2319 = vmatmul.mubr.msk.f32.vlgmr.msra.gmra.mxu0 %vm74_vm0, %v73_v1  ;;  %2356 = vmatprep.subr.mxu0 %v2782_v3 }
  0x11   :  { %2357 = vmatpush3.msra.mxu0 %v2916_v2 }
  0x12   :  { %27 = vsyncpa [#allocation3], 0  ;;  %2325 = vmatprep.subr.mxu1 %v2782_v3  ;;  %2358 = vmatprep.subr.mxu0 %v2782_v3  ;;  %v2944_v6 = vld [vmem:[%s3636_s13 + $0x60] sm:$0xff]  ;;  %v2953_v7 = vld [vmem:[%s3636_s13 + $0x58] sm:$0xff]  ;;  %s3657_s26 = sld [smem:[#allocation7_spill]]  ;;  %v2784_v20 = vmov 0  }
  0x13   :  { %2326 = vmatpush3.msra.mxu1 %v2935_v5  ;;  %2359 = vmatpush3.msra.mxu0 %v2926_v4  ;;  %v2962_v8 = vld [vmem:[%s3636_s13 + $0x50] sm:$0xff]  ;;  %v2971_v9 = vld [vmem:[%s3636_s13 + $0x48] sm:$0xff]  ;;  %v2980_v10 = vld [vmem:[%s3636_s13 + $0x40] sm:$0xff]  ;;  %s3659_s30 = sld [smem:[#allocation10_spill]]  ;;  %s2785_s0 = smov 1  }
  0x14   :  { %2327 = vmatprep.subr.mxu1 %v2782_v3  ;;  %2360 = vmatprep.subr.mxu0 %v2782_v3  ;;  %v2989_v11 = vld [vmem:[%s3636_s13 + $0x38] sm:$0xff]  ;;  %v2998_v12 = vld [vmem:[%s3636_s13 + $0x30] sm:$0xff]  ;;  %v3007_v13 = vld [vmem:[%s3636_s13 + $0x28] sm:$0xff]  ;;  %s2786_s23 = smov 127   ;;  %s3661_s24 = sld [smem:[#allocation11_spill]] }
  0x15   :  { %2328 = vmatpush3.msra.mxu1 %v2944_v6  ;;  %2361 = vmatpush3.msra.mxu0 %v2935_v5  ;;  %v3016_v14 = vld [vmem:[%s3636_s13 + $0x20] sm:$0xff]  ;;  %v3025_v15 = vld [vmem:[%s3636_s13 + $0x18] sm:$0xff]  ;;  %v3034_v16 = vld [vmem:[%s3636_s13 + $0x10] sm:$0xff] }
  0x16   :  { %2329 = vmatprep.subr.mxu1 %v2782_v3  ;;  %2362 = vmatprep.subr.mxu0 %v2782_v3  ;;  %v3043_v17 = vld [vmem:[%s3636_s13 + $0x8] sm:$0xff]  ;;  %v3062_v18 = vld [vmem:[%s3636_s13] sm:$0xff]  ;;  %s3658_s13 = sld [smem:[#allocation8_spill]] }
  0x17   :  { %2330 = vmatpush3.msra.mxu1 %v2953_v7  ;;  %2363 = vmatpush3.msra.mxu0 %v2944_v6  ;;  %v1147_v23 = vld [vmem:[%s3631_s8] sm:$0xff]  ;;  %v1148_v1 = vld [vmem:[%s3631_s8 + $0x8] sm:$0xff] }
  0x18   :  { %2331 = vmatprep.subr.mxu1 %v2782_v3  ;;  %2364 = vmatprep.subr.mxu0 %v2782_v3  ;;  %v148_v19 = vld [vmem:[%s3657_s26] sm:$0xff] }
  0x19   :  { %2332 = vmatpush3.msra.mxu1 %v2962_v8  ;;  %2365 = vmatpush3.msra.mxu0 %v2953_v7  ;;  %v591_v22 = vld [vmem:[%s3659_s30] sm:$0xff] }
  0x1a   :  { %2333 = vmatprep.subr.mxu1 %v2782_v3  ;;  %2366 = vmatprep.subr.mxu0 %v2782_v3  ;;  %v1149_v24 = vld [vmem:[%s3632_s9] sm:$0xff] }
  0x1b   :  { %2334 = vmatpush3.msra.mxu1 %v2971_v9  ;;  %2367 = vmatpush3.msra.mxu0 %v2962_v8  ;;  %v1700_v25 = vld [vmem:[%s3634_s11] sm:$0xff] }
  0x1c   :  { %2335 = vmatprep.subr.mxu1 %v2782_v3  ;;  %2368 = vmatprep.subr.mxu0 %v2782_v3  ;;  %v149_v21 = vld [vmem:[%s3658_s13] sm:$0xff]  ;;  %s3660_s13 = sld [smem:[#allocation9_spill]] }
  0x1d   :  { %2336 = vmatpush3.msra.mxu1 %v2980_v10  ;;  %2369 = vmatpush3.msra.mxu0 %v2971_v9  ;;  %v1702_v26 = vld [vmem:[%s3635_s12] sm:$0xff] }
  0x1e   :  { %2337 = vmatprep.subr.mxu1 %v2782_v3  ;;  %2370 = vmatprep.subr.mxu0 %v2782_v3  ;;  %v3133_v30 = vld [vmem:[%s3637_s14] sm:$0xff] }
  0x1f   :  { %2338 = vmatpush3.msra.mxu1 %v2989_v11  ;;  %2371 = vmatpush3.msra.mxu0 %v2980_v10  ;;  %v592_v63 = vld [vmem:[%s3661_s24] sm:$0xff] }
  0x20   :  { %2339 = vmatprep.subr.mxu1 %v2782_v3  ;;  %2372 = vmatprep.subr.mxu0 %v2782_v3 }
  0x21   :  { %2340 = vmatpush3.msra.mxu1 %v2998_v12  ;;  %2373 = vmatpush3.msra.mxu0 %v2989_v11 }
  0x22   :  { %2341 = vmatprep.subr.mxu1 %v2782_v3  ;;  %2374 = vmatprep.subr.mxu0 %v2782_v3  ;;  %v477_v54 = vld [vmem:[%s3660_s13] sm:$0xff]  ;;  %v478_v55 = vld [vmem:[%s3660_s13 + $0x8] sm:$0xff]  ;;  %v479_v56 = vld [vmem:[%s3660_s13 + $0x10] sm:$0xff] }
  0x23   :  { %2342 = vmatpush3.msra.mxu1 %v3007_v13  ;;  %2375 = vmatpush3.msra.mxu0 %v2998_v12 }
  0x24   :  { %2343 = vmatprep.subr.mxu1 %v2782_v3  ;;  %2376 = vmatprep.subr.mxu0 %v2782_v3 }
  0x25   :  { %2344 = vmatpush3.msra.mxu1 %v3016_v14  ;;  %2377 = vmatpush3.msra.mxu0 %v3007_v13 }
  0x26   :  { %2345 = vmatprep.subr.mxu1 %v2782_v3  ;;  %2378 = vmatprep.subr.mxu0 %v2782_v3 }
  0x27   :  { %2346 = vmatpush3.msra.mxu1 %v3025_v15  ;;  %2379 = vmatpush3.msra.mxu0 %v3016_v14 }
  0x28   :  { %2347 = vmatprep.subr.mxu1 %v2782_v3  ;;  %2380 = vmatprep.subr.mxu0 %v2782_v3 }
  0x29   :  { %2348 = vmatpush3.msra.mxu1 %v3034_v16  ;;  %2381 = vmatpush3.msra.mxu0 %v3025_v15 }
  0x2a   :  { %2349 = vmatprep.subr.mxu1 %v2782_v3  ;;  %2382 = vmatprep.subr.mxu0 %v2782_v3 }
  0x2b   :  { %2350 = vmatpush3.msra.mxu1 %v3043_v17  ;;  %2383 = vmatpush3.msra.mxu0 %v3034_v16 }
  0x2c   :  { %2351 = vmatprep.subr.mxu1 %v2782_v3  ;;  %2384 = vmatprep.subr.mxu0 %v2782_v3 }
  0x2d   :  { %2353 = vmatprep.mubr.msk.f32.mxu1 %vm2783_vm1, %v2782_v3  ;;  %2385 = vmatpush3.msra.mxu0 %v3043_v17 }
  0x2e   :  { %2386 = vmatprep.subr.mxu0 %v2782_v3  ;;  %2388 = vmatprep.mubr.msk.f32.mxu0 %vm2783_vm1, %v2782_v3 }
  0x2f   :  { %2352 = vmatpush3.msra.mxu1 %v3062_v18  ;;  %2387 = vmatpush3.msra.mxu0 %v3062_v18 }
  0x30   :  { %2391 = vmatprep.subr.mxu1 %v2782_v3  ;;  %2412 = vmatprep.subr.mxu0 %v2782_v3 }
  0x31   :  { %2745 = vset.pattern.permute.xlu0 %v2784_v20  ;;  %2746 = vset.pattern.permute.xlu1 %v2784_v20 }
  0x32   :  { %316 = vperm.xlu0 %2745, %v148_v19  }
  0x36   :  { %323 = vperm.xlu0 %2745, %v149_v21  }
  0x3a   :  { %743 = vperm.xlu0 %2745, %v591_v22  }
  0x3e   :  { %1335 = vperm.xlu0 %2745, %v1147_v23  }
  0x42   :  { %1349 = vperm.xlu0 %2745, %v1149_v24  }
  0x46   :  { %1872 = vperm.xlu0 %2745, %v1700_v25  }
  0x4a   :  { %1886 = vperm.xlu0 %2745, %v1702_v26  }
  0xad   :  { %v317_v41 = vpop.permute.xlu0 %316 }
  0xb1   :  { %v324_v45 = vpop.permute.xlu0 %323 }
  0xb5   :  { %v744_v26 = vpop.permute.xlu0 %743 }
  0xd0   :  { %v3089_v27 = vpop.f32.mrf.mxu0 }
  0xd1   :  { %v236_v28 = vmul.f32 %v3089_v27, %v3089_v27  ;;  %2354 = vmatmul.mubr.f32.vlgmr.msra.gmra.mxu1 %v3089_v27 }
  0xd2   :  { %v2320_v29 = vpop.f32.mrf.mxu0  ;;  %2393 = vmatprep.mubr.msk.f32.mxu1 %vm2783_vm1, %v2782_v3  ;;  %2392 = vmatpush3.msra.mxu1 %v3133_v30 }
  0xd3   :  { %2389 = vmatmul.mubr.f32.vlgmr.msra.gmra.mxu0 %v236_v28  ;;  %2396 = vmatprep.subr.mxu1 %v2782_v3  ;;  %v920_v28 = vld [vmem:[%s3641_s18] sm:$0xff] }
  0xd4   :  { %2413 = vmatpush3.msra.mxu0 %v2916_v2  ;;  %2444 = vmatprep.mubr.msk.f32.mxu0 %vm2783_vm1, %v2782_v3 }
  0xd5   :  { %2414 = vmatprep.subr.mxu0 %v2782_v3 }
  0xd6   :  { %2415 = vmatpush3.msra.mxu0 %v2926_v4 }
  0xd7   :  { %2416 = vmatprep.subr.mxu0 %v2782_v3 }
  0xd8   :  { %2417 = vmatpush3.msra.mxu0 %v2935_v5 }
  0xd9   :  { %2418 = vmatprep.subr.mxu0 %v2782_v3 }
  0xda   :  { %2419 = vmatpush3.msra.mxu0 %v2944_v6 }
  0xdb   :  { %2420 = vmatprep.subr.mxu0 %v2782_v3 }
  0xdc   :  { %2421 = vmatpush3.msra.mxu0 %v2953_v7 }
  0xdd   :  { %2422 = vmatprep.subr.mxu0 %v2782_v3 }
  0xde   :  { %2423 = vmatpush3.msra.mxu0 %v2962_v8 }
  0xdf   :  { %2424 = vmatprep.subr.mxu0 %v2782_v3 }
  0xe0   :  { %2425 = vmatpush3.msra.mxu0 %v2971_v9 }
  0xe1   :  { %2426 = vmatprep.subr.mxu0 %v2782_v3 }
  0xe2   :  { %2427 = vmatpush3.msra.mxu0 %v2980_v10 }
  0xe3   :  { %2428 = vmatprep.subr.mxu0 %v2782_v3 }
  0xe4   :  { %2429 = vmatpush3.msra.mxu0 %v2989_v11 }
  0xe5   :  { %2430 = vmatprep.subr.mxu0 %v2782_v3 }
  0xe6   :  { %2431 = vmatpush3.msra.mxu0 %v2998_v12 }
  0xe7   :  { %2432 = vmatprep.subr.mxu0 %v2782_v3 }
  0xe8   :  { %2433 = vmatpush3.msra.mxu0 %v3007_v13 }
  0xe9   :  { %2434 = vmatprep.subr.mxu0 %v2782_v3 }
  0xea   :  { %2435 = vmatpush3.msra.mxu0 %v3016_v14 }
  0xeb   :  { %2436 = vmatprep.subr.mxu0 %v2782_v3 }
  0xec   :  { %2437 = vmatpush3.msra.mxu0 %v3025_v15 }
  0xed   :  { %2438 = vmatprep.subr.mxu0 %v2782_v3 }
  0xee   :  { %2439 = vmatpush3.msra.mxu0 %v3034_v16 }
  0xef   :  { %2440 = vmatprep.subr.mxu0 %v2782_v3 }
  0xf0   :  { %2441 = vmatpush3.msra.mxu0 %v3043_v17 }
  0xf1   :  { %2442 = vmatprep.subr.mxu0 %v2782_v3 }
  0xf2   :  { %2443 = vmatpush3.msra.mxu0 %v3062_v18 }
  0xf3   :  { %2482 = vmatprep.subr.mxu0 %v2782_v3 }
 0x191   :  { %v232_v31 = vpop.f32.mrf.mxu1 }
 0x192   :  { %v307_v32 = vmul.f32 0.0625, %v232_v31 }
 0x193   :  { %v2355_v33 = vpop.f32.mrf.mxu1  ;;  %v303_v34 = vpop.f32.mrf.mxu0 }
 0x194   :  { %v309_v35 = vmul.f32 %v307_v32, %v307_v32  ;;  %v308_v36 = vmul.f32 0.0625, %v303_v34  ;;  %v918_v34 = vld [vmem:[%s3640_s17 + $0x70] sm:$0xff] }
 0x195   :  { %v2390_v37 = vpop.f32.mrf.mxu0 }
 0x196   :  { %v310_v38 = vsub.f32 %v308_v36, %v309_v35  ;;  %v917_v35 = vld [vmem:[%s3640_s17 + $0x68] sm:$0xff]  ;;  %v916_v36 = vld [vmem:[%s3640_s17 + $0x60] sm:$0xff]  ;;  %v915_v37 = vld [vmem:[%s3640_s17 + $0x58] sm:$0xff] }
 0x198   :  { %v311_v39 = vmax.f32 %v310_v38, 0.0  ;;  %v914_v38 = vld [vmem:[%s3640_s17 + $0x50] sm:$0xff] }
 0x19a   :  { %v312_v40 = vadd.f32 1e-05, %v311_v39  ;;  %v913_v39 = vld [vmem:[%s3640_s17 + $0x48] sm:$0xff] }
 0x19c   :  { %2747 = vrsqrt.f32 %v312_v40  ;;  %v912_v40 = vld [vmem:[%s3640_s17 + $0x40] sm:$0xff] }
 0x1a9   :  { %v2748_v42 = vpop.eup %2747 }
 0x1aa   :  { %v319_v43 = vmul.f32 %v2748_v42, %v317_v41  ;;  %v911_v41 = vld [vmem:[%s3640_s17 + $0x38] sm:$0xff]  ;;  %v910_v42 = vld [vmem:[%s3640_s17 + $0x30] sm:$0xff] }
 0x1ac   :  { %v320_v44 = vmul.f32 %v319_v43, %v307_v32  ;;  %2394 = vmatmul.mubr.msk.f32.vlgmr.msra.gmra.mxu1 %vm74_vm0, %v319_v43  ;;  %v919_v32 = vld [vmem:[%s3640_s17 + $0x78] sm:$0xff]  ;;  %v909_v43 = vld [vmem:[%s3640_s17 + $0x28] sm:$0xff] }
 0x1ad   :  { %2397 = vmatpush3.msra.mxu1 %v3133_v30  ;;  %2398 = vmatprep.mubr.msk.f32.mxu1 %vm2783_vm1, %v2782_v3 }
 0x1ae   :  { %v326_v46 = vsub.f32 %v324_v45, %v320_v44  ;;  %2401 = vmatprep.subr.mxu1 %v2782_v3  ;;  %v908_v44 = vld [vmem:[%s3640_s17 + $0x20] sm:$0xff]  ;;  %v907_v45 = vld [vmem:[%s3640_s17 + $0x18] sm:$0xff] }
 0x1b0   :  { %2399 = vmatmul.mubr.msk.f32.vlgmr.msra.gmra.mxu1 %vm74_vm0, %v326_v46  ;;  %v906_v46 = vld [vmem:[%s3640_s17 + $0x10] sm:$0xff] }
 0x1b1   :  { %2403 = vmatprep.mubr.msk.f32.mxu1 %vm2783_vm1, %v2782_v3 }
 0x26c   :  { %v397_v47 = vpop.f32.mrf.mxu1 }
 0x26d   :  { %v401_v49 = vmul.f32 %v397_v47, %v3089_v27  ;;  %v905_v47 = vld [vmem:[%s3640_s17 + $0x8] sm:$0xff] }
 0x26e   :  { %v2395_v48 = vpop.f32.mrf.mxu1 }
 0x26f   :  { %v904_v48 = vld [vmem:[%s3640_s17] sm:$0xff] }
 0x270   :  { %v471_v50 = vpop.f32.mrf.mxu1 }
 0x271   :  { %v475_v51 = vadd.f32 %v471_v50, %v401_v49 }
 0x272   :  { %v2400_v52 = vpop.f32.mrf.mxu1 }
 0x273   :  { %v476_v53 = vmax.f32 %v475_v51, 0.0 }
 0x275   :  { %2402 = vmatpush3.msra.mxu1 %v476_v53 }
 0x276   :  { %2404 = vmatmul.mubr.msk.f32.vlgmr.msra.gmra.mxu1 %vm74_vm0, %v477_v54  ;;  %2447 = vmatprep.subr.mxu1 %v2782_v3 }
 0x277   :  { %2406 = vmatprep.mubr.msk.f32.mxu1 %vm2783_vm1, %v2782_v3  ;;  %2448 = vmatpush3.msra.mxu1 %v2916_v2  ;;  %v1150_v2 = vld [vmem:[%s3632_s9 + $0x8] sm:$0xff] }
 0x278   :  { %2449 = vmatprep.subr.mxu1 %v2782_v3 }
 0x279   :  { %2450 = vmatpush3.msra.mxu1 %v2926_v4  ;;  %v1701_v4 = vld [vmem:[%s3634_s11 + $0x8] sm:$0xff] }
 0x27a   :  { %2407 = vmatmul.mubr.msk.f32.gmra.mxu1 %vm74_vm0, %v478_v55  ;;  %2451 = vmatprep.subr.mxu1 %v2782_v3 }
 0x27b   :  { %2409 = vmatprep.mubr.msk.f32.mxu1 %vm2783_vm1, %v2782_v3  ;;  %2452 = vmatpush3.msra.mxu1 %v2935_v5  ;;  %v1703_v5 = vld [vmem:[%s3635_s12 + $0x8] sm:$0xff] }
 0x27c   :  { %2453 = vmatprep.subr.mxu1 %v2782_v3 }
 0x27d   :  { %2454 = vmatpush3.msra.mxu1 %v2944_v6  ;;  %v2090_v6 = vld [vmem:[%s3638_s15] ss:$0 sm:$0xff] }
 0x27e   :  { %2410 = vmatmul.mubr.msk.f32.gmra.mxu1 %vm74_vm0, %v479_v56  ;;  %2455 = vmatprep.subr.mxu1 %v2782_v3 }
 0x27f   :  { %2456 = vmatpush3.msra.mxu1 %v2953_v7  ;;  %2479 = vmatprep.mubr.msk.f32.mxu1 %vm2783_vm1, %v2782_v3 }
 0x280   :  { %2457 = vmatprep.subr.mxu1 %v2782_v3 }
 0x281   :  { %2458 = vmatpush3.msra.mxu1 %v2962_v8 }
 0x282   :  { %2459 = vmatprep.subr.mxu1 %v2782_v3 }
 0x283   :  { %2460 = vmatpush3.msra.mxu1 %v2971_v9  ;;  %v2091_v9 = vld [vmem:[%s3639_s16] ss:$0 sm:$0xff] }
 0x284   :  { %2461 = vmatprep.subr.mxu1 %v2782_v3 }
 0x285   :  { %2462 = vmatpush3.msra.mxu1 %v2980_v10 }
 0x286   :  { %2463 = vmatprep.subr.mxu1 %v2782_v3 }
 0x287   :  { %2464 = vmatpush3.msra.mxu1 %v2989_v11 }
 0x288   :  { %2465 = vmatprep.subr.mxu1 %v2782_v3 }
 0x289   :  { %2466 = vmatpush3.msra.mxu1 %v2998_v12 }
 0x28a   :  { %2467 = vmatprep.subr.mxu1 %v2782_v3 }
 0x28b   :  { %2468 = vmatpush3.msra.mxu1 %v3007_v13 }
 0x28c   :  { %2469 = vmatprep.subr.mxu1 %v2782_v3 }
 0x28d   :  { %2470 = vmatpush3.msra.mxu1 %v3016_v14 }
 0x28e   :  { %2471 = vmatprep.subr.mxu1 %v2782_v3 }
 0x28f   :  { %2472 = vmatpush3.msra.mxu1 %v3025_v15 }
 0x290   :  { %2473 = vmatprep.subr.mxu1 %v2782_v3 }
 0x291   :  { %2474 = vmatpush3.msra.mxu1 %v3034_v16 }
 0x292   :  { %2475 = vmatprep.subr.mxu1 %v2782_v3 }
 0x293   :  { %2476 = vmatpush3.msra.mxu1 %v3043_v17 }
 0x294   :  { %2477 = vmatprep.subr.mxu1 %v2782_v3 }
 0x295   :  { %2478 = vmatpush3.msra.mxu1 %v3062_v18 }
 0x296   :  { %2487 = vmatprep.subr.mxu1 %v2782_v3 }
 0x336   :  { %v555_v57 = vpop.f32.mrf.mxu1 }
 0x337   :  { %569 = vrot.lane.b32.xlu1 %v555_v57, %s2785_s0 }
 0x338   :  { %v2405_v58 = vpop.f32.mrf.mxu1 }
 0x339   :  { %v3312_v58 = vld [vmem:[%s3642_s19 + $0x78] sm:$0xff] }
 0x33a   :  { %v560_v59 = vpop.f32.mrf.mxu1 }
 0x33c   :  { %v2408_v60 = vpop.f32.mrf.mxu1 }
 0x33d   :  { %v3325_v60 = vld [vmem:[%s3642_s19 + $0x68] sm:$0xff] }
 0x33e   :  { %v565_v61 = vpop.f32.mrf.mxu1 }
 0x33f   :  { %580 = vrot.lane.b32.xlu1 %v565_v61, %s2786_s23  ;;  %v3332_v61 = vld [vmem:[%s3642_s19 + $0x60] sm:$0xff] }
 0x340   :  { %v2411_v62 = vpop.f32.mrf.mxu1 }
 0x341   :  { %v3339_v62 = vld [vmem:[%s3642_s19 + $0x58] sm:$0xff] }
 0x343   :  { %750 = vperm.xlu1 %2746, %v592_v63   ;;  %v3346_v63 = vld [vmem:[%s3642_s19 + $0x50] sm:$0xff] }
 0x347   :  { %1340 = vperm.xlu1 %2746, %v1148_v1   ;;  %v3353_v1 = vld [vmem:[%s3642_s19 + $0x48] sm:$0xff] }
 0x34b   :  { %1354 = vperm.xlu1 %2746, %v1150_v2   ;;  %v3360_v2 = vld [vmem:[%s3642_s19 + $0x40] sm:$0xff] }
 0x34f   :  { %1877 = vperm.xlu1 %2746, %v1701_v4   ;;  %v3367_v4 = vld [vmem:[%s3642_s19 + $0x38] sm:$0xff] }
 0x353   :  { %1891 = vperm.xlu1 %2746, %v1703_v5   ;;  %v3374_v5 = vld [vmem:[%s3642_s19 + $0x30] sm:$0xff] }
 0x3a9   :  { %v570_v7 = vpop.permute.xlu1 %569 }
 0x3aa   :  { %v578_v8 = vmul.f32 %v2090_v6, %v570_v7  ;;  %v3381_v6 = vld [vmem:[%s3642_s19 + $0x28] sm:$0xff]  ;;  %v3388_v7 = vld [vmem:[%s3642_s19 + $0x20] sm:$0xff] }
 0x3ac   :  { %v579_v11 = vadd.f32 %v578_v8, %v560_v59  ;;  %v3318_v59 = vld [vmem:[%s3642_s19 + $0x70] sm:$0xff]  ;;  %v3395_v8 = vld [vmem:[%s3642_s19 + $0x18] sm:$0xff] }
 0x3b1   :  { %v581_v10 = vpop.permute.xlu1 %580 }
 0x3b2   :  { %v589_v12 = vmul.f32 %v2091_v9, %v581_v10  ;;  %v3402_v9 = vld [vmem:[%s3642_s19 + $0x10] sm:$0xff] }
 0x3b4   :  { %v3218_v13 = vadd.f32 %v589_v12, %v579_v11 }
 0x3b6   :  { %v663_v14 = vmul.f32 %v3218_v13, %v3218_v13  ;;  %2445 = vmatmul.mubr.f32.vlgmr.msra.gmra.mxu0 %v3218_v13 }
 0x3b7   :  { %2483 = vmatpush3.msra.mxu0 %v3133_v30  ;;  %2484 = vmatprep.mubr.msk.f32.mxu0 %vm2783_vm1, %v2782_v3 }
 0x3b8   :  { %2480 = vmatmul.mubr.f32.vlgmr.msra.gmra.mxu1 %v663_v14  ;;  %2492 = vmatprep.subr.mxu0 %v2782_v3  ;;  %v3442_v14 = vld [vmem:[%s3642_s19 + $0x8] sm:$0xff] }
 0x3b9   :  { %2488 = vmatpush3.msra.mxu1 %v3133_v30  ;;  %2489 = vmatprep.mubr.msk.f32.mxu1 %vm2783_vm1, %v2782_v3 }
 0x3ba   :  { %2497 = vmatprep.subr.mxu1 %v2782_v3 }
 0x3be   :  { %v751_v30 = vpop.permute.xlu1 %750 }
 0x476   :  { %v659_v15 = vpop.f32.mrf.mxu0 }
 0x477   :  { %v734_v16 = vmul.f32 0.020833334, %v659_v15  ;;  %v3450_v15 = vld [vmem:[%s3642_s19] sm:$0xff] }
 0x478   :  { %v2446_v17 = vpop.f32.mrf.mxu0  ;;  %v730_v18 = vpop.f32.mrf.mxu1 }
 0x479   :  { %v736_v19 = vmul.f32 %v734_v16, %v734_v16  ;;  %v735_v20 = vmul.f32 0.020833334, %v730_v18 }
 0x47a   :  { %v2481_v21 = vpop.f32.mrf.mxu1 }
 0x47b   :  { %v737_v22 = vsub.f32 %v735_v20, %v736_v19  ;;  %v3502_v20 = vld [vmem:[%s3643_s20] sm:$0xff] }
 0x47d   :  { %v738_v23 = vmax.f32 %v737_v22, 0.0 }
 0x47f   :  { %v739_v24 = vadd.f32 1e-05, %v738_v23 }
 0x481   :  { %2749 = vrsqrt.f32 %v739_v24 }
 0x48e   :  { %v2750_v25 = vpop.eup %2749 }
 0x48f   :  { %v746_v27 = vmul.f32 %v2750_v25, %v744_v26 }
 0x491   :  { %v747_v29 = vmul.f32 %v746_v27, %v734_v16  ;;  %2485 = vmatmul.mubr.msk.f32.vlgmr.msra.gmra.mxu0 %vm74_vm0, %v746_v27 }
 0x492   :  { %2493 = vmatpush3.msra.mxu0 %v920_v28  ;;  %2494 = vmatprep.mubr.msk.f32.mxu0 %vm2783_vm1, %v2782_v3 }
 0x493   :  { %v753_v31 = vsub.f32 %v751_v30, %v747_v29 }
 0x495   :  { %v903_v33 = vmax.f32 %v753_v31, 0.0  ;;  %2490 = vmatmul.mubr.msk.f32.vlgmr.msra.gmra.mxu1 %vm74_vm0, %v753_v31 }
 0x496   :  { %2498 = vmatpush3.msra.mxu1 %v919_v32  ;;  %2529 = vmatprep.mubr.msk.f32.mxu1 %vm2783_vm1, %v2782_v3 }
 0x497   :  { %2495 = vmatmul.mubr.msk.f32.vlgmr.msra.gmra.mxu0 %vm74_vm0, %v903_v33  ;;  %2499 = vmatprep.subr.mxu1 %v2782_v3 }
 0x498   :  { %2500 = vmatpush3.msra.mxu1 %v918_v34 }
 0x499   :  { %2501 = vmatprep.subr.mxu1 %v2782_v3 }
 0x49a   :  { %2502 = vmatpush3.msra.mxu1 %v917_v35 }
 0x49b   :  { %2503 = vmatprep.subr.mxu1 %v2782_v3 }
 0x49c   :  { %2504 = vmatpush3.msra.mxu1 %v916_v36 }
 0x49d   :  { %2505 = vmatprep.subr.mxu1 %v2782_v3 }
 0x49e   :  { %2506 = vmatpush3.msra.mxu1 %v915_v37 }
 0x49f   :  { %2507 = vmatprep.subr.mxu1 %v2782_v3 }
 0x4a0   :  { %2508 = vmatpush3.msra.mxu1 %v914_v38  ;;  %v1336_v38 = vpop.permute.xlu0 %1335 }
 0x4a1   :  { %2509 = vmatprep.subr.mxu1 %v2782_v3 }
 0x4a2   :  { %2510 = vmatpush3.msra.mxu1 %v913_v39  ;;  %v1341_v39 = vpop.permute.xlu1 %1340 }
 0x4a3   :  { %2511 = vmatprep.subr.mxu1 %v2782_v3 }
 0x4a4   :  { %2512 = vmatpush3.msra.mxu1 %v912_v40 }
 0x4a5   :  { %2513 = vmatprep.subr.mxu1 %v2782_v3 }
 0x4a6   :  { %2514 = vmatpush3.msra.mxu1 %v911_v41 }
 0x4a7   :  { %2515 = vmatprep.subr.mxu1 %v2782_v3 }
 0x4a8   :  { %2516 = vmatpush3.msra.mxu1 %v910_v42 }
 0x4a9   :  { %2517 = vmatprep.subr.mxu1 %v2782_v3 }
 0x4aa   :  { %2518 = vmatpush3.msra.mxu1 %v909_v43 }
 0x4ab   :  { %2519 = vmatprep.subr.mxu1 %v2782_v3 }
 0x4ac   :  { %2520 = vmatpush3.msra.mxu1 %v908_v44 }
 0x4ad   :  { %2521 = vmatprep.subr.mxu1 %v2782_v3 }
 0x4ae   :  { %2522 = vmatpush3.msra.mxu1 %v907_v45  ;;  %v1350_v45 = vpop.permute.xlu0 %1349 }
 0x4af   :  { %2523 = vmatprep.subr.mxu1 %v2782_v3 }
 0x4b0   :  { %2524 = vmatpush3.msra.mxu1 %v906_v46  ;;  %v1355_v46 = vpop.permute.xlu1 %1354 }
 0x4b1   :  { %2525 = vmatprep.subr.mxu1 %v2782_v3 }
 0x4b2   :  { %2526 = vmatpush3.msra.mxu1 %v905_v47 }
 0x4b3   :  { %2527 = vmatprep.subr.mxu1 %v2782_v3  ;;  %v1064_v3 = vld [vmem:[%s3630_s7] sm:$0xff] }
 0x4b4   :  { %2528 = vmatpush3.msra.mxu1 %v904_v48  ;;  %2534 = vmatprep.mubr.msk.f32.mxu0 %vm74_vm0, %v1064_v3  ;;  %v1617_v3 = vld [vmem:[%s3644_s21 + $0x40] sm:$0xff] }
 0x4b5   :  { %2572 = vmatprep.subr.mxu1 %v3312_v58 }
 0x551   :  { %v823_v49 = vpop.f32.mrf.mxu0 }
 0x552   :  { %v827_v51 = vmul.f32 %v823_v49, %v3218_v13  ;;  %v1065_v13 = vld [vmem:[%s3630_s7 + $0x8] sm:$0xff]  ;;  %v1526_v49 = vld [vmem:[%s3633_s10] sm:$0xff] }
 0x553   :  { %v2486_v50 = vpop.f32.mrf.mxu0 }
 0x554   :  { %v1624_v50 = vld [vmem:[%s3644_s21 + $0x78] sm:$0xff] }
 0x555   :  { %v897_v52 = vpop.f32.mrf.mxu1 }
 0x556   :  { %v901_v53 = vadd.f32 %v897_v52, %v827_v51  ;;  %v2759_v51 = vld [vmem:[%s3655_s29] sm:$0xff]  ;;  %v1623_v52 = vld [vmem:[%s3644_s21 + $0x70] sm:$0xff] }
 0x557   :  { %v2491_v54 = vpop.f32.mrf.mxu1  ;;  %v990_v55 = vpop.f32.mrf.mxu0 }
 0x558   :  { %v902_v56 = vmax.f32 %v901_v53, 0.0  ;;  %v1622_v53 = vld [vmem:[%s3644_s21 + $0x68] sm:$0xff]  ;;  %v1621_v54 = vld [vmem:[%s3644_s21 + $0x60] sm:$0xff] }
 0x559   :  { %v2496_v57 = vpop.f32.mrf.mxu0 }
 0x55a   :  { %2530 = vmatmul.mubr.f32.vlgmr.msra.gmra.mxu1 %v902_v56  ;;  %v1619_v56 = vld [vmem:[%s3644_s21 + $0x50] sm:$0xff]  ;;  %v1618_v57 = vld [vmem:[%s3644_s21 + $0x48] sm:$0xff] }
 0x55b   :  { %2573 = vmatpush3.msra.mxu1 %v3312_v58 }
 0x55c   :  { %2574 = vmatprep.subr.mxu1 %v3318_v59 }
 0x55d   :  { %2575 = vmatpush3.msra.mxu1 %v3318_v59 }
 0x55e   :  { %2576 = vmatprep.subr.mxu1 %v3325_v60 }
 0x55f   :  { %2577 = vmatpush3.msra.mxu1 %v3325_v60 }
 0x560   :  { %2578 = vmatprep.subr.mxu1 %v3332_v61 }
 0x561   :  { %2579 = vmatpush3.msra.mxu1 %v3332_v61 }
 0x562   :  { %2580 = vmatprep.subr.mxu1 %v3339_v62 }
 0x563   :  { %2581 = vmatpush3.msra.mxu1 %v3339_v62 }
 0x564   :  { %2582 = vmatprep.subr.mxu1 %v3346_v63 }
 0x565   :  { %2583 = vmatpush3.msra.mxu1 %v3346_v63 }
 0x566   :  { %2584 = vmatprep.subr.mxu1 %v3353_v1 }
 0x567   :  { %2585 = vmatpush3.msra.mxu1 %v3353_v1 }
 0x568   :  { %2586 = vmatprep.subr.mxu1 %v3360_v2 }
 0x569   :  { %2587 = vmatpush3.msra.mxu1 %v3360_v2 }
 0x56a   :  { %2588 = vmatprep.subr.mxu1 %v3367_v4 }
 0x56b   :  { %2589 = vmatpush3.msra.mxu1 %v3367_v4 }
 0x56c   :  { %2590 = vmatprep.subr.mxu1 %v3374_v5 }
 0x56d   :  { %2591 = vmatpush3.msra.mxu1 %v3374_v5 }
 0x56e   :  { %2592 = vmatprep.subr.mxu1 %v3381_v6 }
 0x56f   :  { %2593 = vmatpush3.msra.mxu1 %v3381_v6 }
 0x570   :  { %2594 = vmatprep.subr.mxu1 %v3388_v7 }
 0x571   :  { %2595 = vmatpush3.msra.mxu1 %v3388_v7 }
 0x572   :  { %2596 = vmatprep.subr.mxu1 %v3395_v8 }
 0x573   :  { %2597 = vmatpush3.msra.mxu1 %v3395_v8 }
 0x574   :  { %2598 = vmatprep.subr.mxu1 %v3402_v9 }
 0x575   :  { %2599 = vmatpush3.msra.mxu1 %v3402_v9 }
 0x576   :  { %2600 = vmatprep.subr.mxu1 %v3442_v14 }
 0x577   :  { %2601 = vmatpush3.msra.mxu1 %v3442_v14 }
 0x578   :  { %2602 = vmatprep.subr.mxu1 %v3450_v15 }
 0x579   :  { %2603 = vmatpush3.msra.mxu1 %v3450_v15 }
 0x57a   :  { %2657 = vmatprep.subr.mxu1 %v3312_v58 }
 0x61a   :  { %v1060_v10 = vpop.f32.mrf.mxu1 }
 0x61b   :  { %v1061_v11 = vadd.f32 %v1060_v10, %v990_v55  ;;  %v1620_v55 = vld [vmem:[%s3644_s21 + $0x58] sm:$0xff] }
 0x61c   :  { %v2531_v12 = vpop.f32.mrf.mxu1  ;;  %v1616_v10 = vld [vmem:[%s3644_s21 + $0x38] sm:$0xff] }
 0x61d   :  { %2532 = vmatprep.subr.mxu0 %v1061_v11  ;;  %v1614_v12 = vld [vmem:[%s3644_s21 + $0x28] sm:$0xff] }
 0x61e   :  { %2533 = vmatpush3.msra.mxu0 %v1061_v11  ;;  %v1615_v11 = vld [vmem:[%s3644_s21 + $0x30] sm:$0xff] }
 0x61f   :  { %2535 = vmatmul.mubr.msk.f32.vlgmr.msra.gmra.mxu0 %vm74_vm0, %v1065_v13  ;;  %2537 = vmatprep.subr.mxu0 %v3312_v58  ;;  %v1613_v13 = vld [vmem:[%s3644_s21 + $0x20] sm:$0xff] }
 0x620   :  { %2538 = vmatpush3.msra.mxu0 %v3312_v58 }
 0x621   :  { %2539 = vmatprep.subr.mxu0 %v3318_v59 }
 0x622   :  { %2540 = vmatpush3.msra.mxu0 %v3318_v59 }
 0x623   :  { %2541 = vmatprep.subr.mxu0 %v3325_v60 }
 0x624   :  { %2542 = vmatpush3.msra.mxu0 %v3325_v60 }
 0x625   :  { %2543 = vmatprep.subr.mxu0 %v3332_v61 }
 0x626   :  { %2544 = vmatpush3.msra.mxu0 %v3332_v61 }
 0x627   :  { %2545 = vmatprep.subr.mxu0 %v3339_v62 }
 0x628   :  { %2546 = vmatpush3.msra.mxu0 %v3339_v62 }
 0x629   :  { %2547 = vmatprep.subr.mxu0 %v3346_v63 }
 0x62a   :  { %2548 = vmatpush3.msra.mxu0 %v3346_v63 }
 0x62b   :  { %2549 = vmatprep.subr.mxu0 %v3353_v1 }
 0x62c   :  { %2550 = vmatpush3.msra.mxu0 %v3353_v1 }
 0x62d   :  { %2551 = vmatprep.subr.mxu0 %v3360_v2 }
 0x62e   :  { %2552 = vmatpush3.msra.mxu0 %v3360_v2 }
 0x62f   :  { %2553 = vmatprep.subr.mxu0 %v3367_v4 }
 0x630   :  { %2554 = vmatpush3.msra.mxu0 %v3367_v4 }
 0x631   :  { %2555 = vmatprep.subr.mxu0 %v3374_v5 }
 0x632   :  { %2556 = vmatpush3.msra.mxu0 %v3374_v5 }
 0x633   :  { %2557 = vmatprep.subr.mxu0 %v3381_v6 }
 0x634   :  { %2558 = vmatpush3.msra.mxu0 %v3381_v6 }
 0x635   :  { %2559 = vmatprep.subr.mxu0 %v3388_v7 }
 0x636   :  { %2560 = vmatpush3.msra.mxu0 %v3388_v7 }
 0x637   :  { %2561 = vmatprep.subr.mxu0 %v3395_v8 }
 0x638   :  { %2562 = vmatpush3.msra.mxu0 %v3395_v8 }
 0x639   :  { %2563 = vmatprep.subr.mxu0 %v3402_v9 }
 0x63a   :  { %2564 = vmatpush3.msra.mxu0 %v3402_v9 }
 0x63b   :  { %2565 = vmatprep.subr.mxu0 %v3442_v14 }
 0x63c   :  { %2566 = vmatpush3.msra.mxu0 %v3442_v14 }
 0x63d   :  { %2567 = vmatprep.subr.mxu0 %v3450_v15 }
 0x63e   :  { %2568 = vmatpush3.msra.mxu0 %v3450_v15 }
 0x63f   :  { %2607 = vmatprep.subr.mxu0 %v3502_v20 }
 0x6df   :  { %v3458_v16 = vpop.f32.mrf.mxu0 }
 0x6e0   :  { %v1243_v19 = vmul.f32 %v3458_v16, %v3458_v16 }
 0x6e1   :  { %v3460_v17 = vpop.f32.mrf.mxu0 }
 0x6e2   :  { %v1242_v18 = vmul.f32 %v3460_v17, %v3460_v17  ;;  %2569 = vmatprep.mubr.f32.mxu0 %v3460_v17 }
 0x6e3   :  { %2570 = vmatmul.mubr.f32.vlgmr.msra.gmra.mxu0 %v3458_v16 }
 0x6e4   :  { %2604 = vmatprep.mubr.f32.mxu1 %v1242_v18  ;;  %2608 = vmatpush3.msra.mxu0 %v3502_v20  ;;  %v1612_v18 = vld [vmem:[%s3644_s21 + $0x18] sm:$0xff] }
 0x6e5   :  { %2605 = vmatmul.mubr.f32.vlgmr.msra.gmra.mxu1 %v1243_v19  ;;  %2612 = vmatprep.subr.mxu0 %v3502_v20  ;;  %v1611_v19 = vld [vmem:[%s3644_s21 + $0x10] sm:$0xff] }
 0x6e6   :  { %2658 = vmatpush3.msra.mxu1 %v3312_v58 }
 0x6e7   :  { %2659 = vmatprep.subr.mxu1 %v3318_v59 }
 0x6e8   :  { %2660 = vmatpush3.msra.mxu1 %v3318_v59 }
 0x6e9   :  { %2661 = vmatprep.subr.mxu1 %v3325_v60 }
 0x6ea   :  { %2662 = vmatpush3.msra.mxu1 %v3325_v60 }
 0x6eb   :  { %2663 = vmatprep.subr.mxu1 %v3332_v61 }
 0x6ec   :  { %2664 = vmatpush3.msra.mxu1 %v3332_v61 }
 0x6ed   :  { %2665 = vmatprep.subr.mxu1 %v3339_v62 }
 0x6ee   :  { %2666 = vmatpush3.msra.mxu1 %v3339_v62 }
 0x6ef   :  { %2667 = vmatprep.subr.mxu1 %v3346_v63 }
 0x6f0   :  { %2668 = vmatpush3.msra.mxu1 %v3346_v63 }
 0x6f1   :  { %2669 = vmatprep.subr.mxu1 %v3353_v1 }
 0x6f2   :  { %2670 = vmatpush3.msra.mxu1 %v3353_v1 }
 0x6f3   :  { %2671 = vmatprep.subr.mxu1 %v3360_v2 }
 0x6f4   :  { %2672 = vmatpush3.msra.mxu1 %v3360_v2 }
 0x6f5   :  { %2673 = vmatprep.subr.mxu1 %v3367_v4 }
 0x6f6   :  { %2674 = vmatpush3.msra.mxu1 %v3367_v4 }
 0x6f7   :  { %2675 = vmatprep.subr.mxu1 %v3374_v5 }
 0x6f8   :  { %2676 = vmatpush3.msra.mxu1 %v3374_v5 }
 0x6f9   :  { %2677 = vmatprep.subr.mxu1 %v3381_v6 }
 0x6fa   :  { %2678 = vmatpush3.msra.mxu1 %v3381_v6 }
 0x6fb   :  { %2679 = vmatprep.subr.mxu1 %v3388_v7 }
 0x6fc   :  { %2680 = vmatpush3.msra.mxu1 %v3388_v7 }
 0x6fd   :  { %2681 = vmatprep.subr.mxu1 %v3395_v8 }
 0x6fe   :  { %2682 = vmatpush3.msra.mxu1 %v3395_v8 }
 0x6ff   :  { %2683 = vmatprep.subr.mxu1 %v3402_v9 }
 0x700   :  { %2684 = vmatpush3.msra.mxu1 %v3402_v9 }
 0x701   :  { %2685 = vmatprep.subr.mxu1 %v3442_v14 }
 0x702   :  { %2686 = vmatpush3.msra.mxu1 %v3442_v14 }
 0x703   :  { %2687 = vmatprep.subr.mxu1 %v3450_v15 }
 0x704   :  { %2688 = vmatpush3.msra.mxu1 %v3450_v15 }
 0x705   :  { %2727 = vmatprep.subr.mxu1 %v3502_v20 }
 0x7a3   :  { %v2571_v21 = vpop.f32.mrf.mxu0 }
 0x7a4   :  { %v1320_v22 = vmul.f32 0.0625, %v2571_v21  ;;  %v1610_v21 = vld [vmem:[%s3644_s21 + $0x8] sm:$0xff] }
 0x7a5   :  { %v1233_v23 = vpop.f32.mrf.mxu0  ;;  %v2606_v24 = vpop.f32.mrf.mxu1 }
 0x7a6   :  { %v1324_v25 = vmul.f32 %v1320_v22, %v1320_v22  ;;  %v1319_v26 = vmul.f32 0.0625, %v1233_v23  ;;  %v1322_v27 = vmul.f32 0.0625, %v2606_v24 }
 0x7a7   :  { %v1310_v28 = vpop.f32.mrf.mxu1 }
 0x7a8   :  { %v1323_v29 = vmul.f32 %v1319_v26, %v1319_v26  ;;  %v1326_v30 = vsub.f32 %v1322_v27, %v1324_v25  ;;  %v1321_v31 = vmul.f32 0.0625, %v1310_v28 }
 0x7aa   :  { %v1328_v32 = vmax.f32 %v1326_v30, 0.0  ;;  %v1325_v33 = vsub.f32 %v1321_v31, %v1323_v29 }
 0x7ac   :  { %v1330_v34 = vadd.f32 1e-05, %v1328_v32  ;;  %v1327_v35 = vmax.f32 %v1325_v33, 0.0 }
 0x7ae   :  { %2751 = vrsqrt.f32 %v1330_v34  ;;  %v1329_v36 = vadd.f32 1e-05, %v1327_v35 }
 0x7b0   :  { %2753 = vrsqrt.f32 %v1329_v36  ;;  %v1873_v36 = vpop.permute.xlu0 %1872 }
 0x7bb   :  { %v2752_v37 = vpop.eup %2751 }
 0x7bc   :  { %v1344_v40 = vmul.f32 %v2752_v37, %v1341_v39  ;;  %v1878_v37 = vpop.permute.xlu1 %1877 }
 0x7bd   :  { %v2754_v41 = vpop.eup %2753 }
 0x7be   :  { %v1343_v42 = vmul.f32 %v2754_v41, %v1336_v38  ;;  %v1346_v43 = vmul.f32 %v1344_v40, %v1320_v22  ;;  %v1609_v22 = vld [vmem:[%s3644_s21] sm:$0xff]  ;;  %s2787_s21 = smov [#allocation2]  }
 0x7bf   :  { %s2073_s23 = sshll.u32 %s2787_s21, 4  ;;  %s2074_s23 = int_to_ptr.vmem [resolvable:$true] %s2073_s23 }
 0x7c0   :  { %2609 = vmatprep.mubr.msk.f32.mxu0 %vm74_vm0, %v1343_v42  ;;  %v1345_v44 = vmul.f32 %v1343_v42, %v1319_v26  ;;  %v1358_v48 = vsub.f32 %v1355_v46, %v1346_v43  ;;  %v1887_v43 = vpop.permute.xlu0 %1886  ;;  %s2760_s1 = scalar_lea.vmem %s2074_s23, 256  ;;  %p2765_p1 = scmp.lt.s32.totalorder %s2074_s23, %s2074_s23 }
 0x7c1   :  { %2610 = vmatmul.mubr.msk.f32.vlgmr.msra.gmra.mxu0 %vm74_vm0, %v1344_v40  ;;  %p2761_p0 = scmp.ne.s32.totalorder %s2074_s23, %s2760_s1  ;;  %p2766_p2 = scmp.lt.s32.totalorder %s2760_s1, %s2760_s1 }
 0x7c2   :  { %2613 = vmatpush3.msra.mxu0 %v3502_v20  ;;  %v1357_v47 = vsub.f32 %v1350_v45, %v1345_v44  ;;  %v1892_v44 = vpop.permute.xlu1 %1891 }
 0x7c3   :  { %2617 = vmatprep.subr.mxu0 %v2908_v0  ;;  %v1527_v0 = vld [vmem:[%s3633_s10 + $0x8] sm:$0xff]  ;;  %p2767_p3 = por %p2766_p2, %p2765_p1 }
 0x7c4   :  { %2614 = vmatprep.mubr.msk.f32.mxu0 %vm74_vm0, %v1357_v47 }
 0x7c5   :  { %2615 = vmatmul.mubr.msk.f32.vlgmr.msra.gmra.mxu0 %vm74_vm0, %v1358_v48  ;;  %p2768_p4 = pnand %p2767_p3, %p2761_p0 }
 0x7c6   :  { %2618 = vmatpush3.msra.mxu0 %v2759_v51  ;;  %2619 = vmatprep.mubr.msk.f32.mxu0 %vm74_vm0, %v1526_v49 }
 0x7c7   :  { %2622 = vmatprep.subr.mxu0 %v1624_v50 }
 0x7c9   :  { %2620 = vmatmul.mubr.msk.f32.vlgmr.msra.gmra.mxu0 %vm74_vm0, %v1527_v0 }
 0x7ca   :  { %2623 = vmatpush3.msra.mxu0 %v1624_v50 }
 0x7cb   :  { %2624 = vmatprep.subr.mxu0 %v1623_v52 }
 0x7cc   :  { %2625 = vmatpush3.msra.mxu0 %v1623_v52 }
 0x7cd   :  { %2626 = vmatprep.subr.mxu0 %v1622_v53 }
 0x7ce   :  { %2627 = vmatpush3.msra.mxu0 %v1622_v53 }
 0x7cf   :  { %2628 = vmatprep.subr.mxu0 %v1621_v54 }
 0x7d0   :  { %2629 = vmatpush3.msra.mxu0 %v1621_v54 }
 0x7d1   :  { %2630 = vmatprep.subr.mxu0 %v1620_v55 }
 0x7d2   :  { %2631 = vmatpush3.msra.mxu0 %v1620_v55 }
 0x7d3   :  { %2632 = vmatprep.subr.mxu0 %v1619_v56 }
 0x7d4   :  { %2633 = vmatpush3.msra.mxu0 %v1619_v56 }
 0x7d5   :  { %2634 = vmatprep.subr.mxu0 %v1618_v57 }
 0x7d6   :  { %2635 = vmatpush3.msra.mxu0 %v1618_v57 }
 0x7d7   :  { %2636 = vmatprep.subr.mxu0 %v1617_v3 }
 0x7d8   :  { %2637 = vmatpush3.msra.mxu0 %v1617_v3 }
 0x7d9   :  { %2638 = vmatprep.subr.mxu0 %v1616_v10 }
 0x7da   :  { %2639 = vmatpush3.msra.mxu0 %v1616_v10 }
 0x7db   :  { %2640 = vmatprep.subr.mxu0 %v1615_v11 }
 0x7dc   :  { %2641 = vmatpush3.msra.mxu0 %v1615_v11 }
 0x7dd   :  { %2642 = vmatprep.subr.mxu0 %v1614_v12 }
 0x7de   :  { %2643 = vmatpush3.msra.mxu0 %v1614_v12 }
 0x7df   :  { %2644 = vmatprep.subr.mxu0 %v1613_v13 }
 0x7e0   :  { %2645 = vmatpush3.msra.mxu0 %v1613_v13 }
 0x7e1   :  { %2646 = vmatprep.subr.mxu0 %v1612_v18 }
 0x7e2   :  { %2647 = vmatpush3.msra.mxu0 %v1612_v18 }
 0x7e3   :  { %2648 = vmatprep.subr.mxu0 %v1611_v19 }
 0x7e4   :  { %2649 = vmatpush3.msra.mxu0 %v1611_v19 }
 0x7e5   :  { %2650 = vmatprep.subr.mxu0 %v1610_v21 }
 0x7e6   :  { %2651 = vmatpush3.msra.mxu0 %v1610_v21 }
 0x7e7   :  { %2652 = vmatprep.subr.mxu0 %v1609_v22 }
 0x7e8   :  { %2653 = vmatpush3.msra.mxu0 %v1609_v22 }
 0x7e9   :  { %2692 = vmatprep.subr.mxu0 %v3312_v58 }
 0x881   :  { %v2611_v23 = vpop.f32.mrf.mxu0 }
 0x882   :  { %v1442_v25 = vmul.f32 %v2611_v23, %v3458_v16 }
 0x883   :  { %v1432_v24 = vpop.f32.mrf.mxu0 }
 0x884   :  { %v1441_v27 = vmul.f32 %v1432_v24, %v3460_v17 }
 0x885   :  { %v2616_v26 = vpop.f32.mrf.mxu0 }
 0x886   :  { %v3576_v28 = vadd.f32 %v2616_v26, %v1442_v25 }
 0x887   :  { %v1515_v29 = vpop.f32.mrf.mxu0 }
 0x888   :  { %v3578_v30 = vadd.f32 %v1515_v29, %v1441_v27 }
 0x889   :  { %v2621_v31 = vpop.f32.mrf.mxu0 }
 0x88b   :  { %v1600_v32 = vpop.f32.mrf.mxu0 }
 0x88c   :  { %2654 = vmatprep.mubr.f32.mxu0 %v1600_v32 }
 0x88d   :  { %2655 = vmatmul.mubr.f32.vlgmr.msra.gmra.mxu0 %v2621_v31 }
 0x88e   :  { %2693 = vmatpush3.msra.mxu0 %v3312_v58 }
 0x88f   :  { %2694 = vmatprep.subr.mxu0 %v3318_v59 }
 0x890   :  { %2695 = vmatpush3.msra.mxu0 %v3318_v59 }
 0x891   :  { %2696 = vmatprep.subr.mxu0 %v3325_v60 }
 0x892   :  { %2697 = vmatpush3.msra.mxu0 %v3325_v60 }
 0x893   :  { %2698 = vmatprep.subr.mxu0 %v3332_v61 }
 0x894   :  { %2699 = vmatpush3.msra.mxu0 %v3332_v61 }
 0x895   :  { %2700 = vmatprep.subr.mxu0 %v3339_v62 }
 0x896   :  { %2701 = vmatpush3.msra.mxu0 %v3339_v62 }
 0x897   :  { %2702 = vmatprep.subr.mxu0 %v3346_v63 }
 0x898   :  { %2703 = vmatpush3.msra.mxu0 %v3346_v63 }
 0x899   :  { %2704 = vmatprep.subr.mxu0 %v3353_v1 }
 0x89a   :  { %2705 = vmatpush3.msra.mxu0 %v3353_v1 }
 0x89b   :  { %2706 = vmatprep.subr.mxu0 %v3360_v2 }
 0x89c   :  { %2707 = vmatpush3.msra.mxu0 %v3360_v2 }
 0x89d   :  { %2708 = vmatprep.subr.mxu0 %v3367_v4 }
 0x89e   :  { %2709 = vmatpush3.msra.mxu0 %v3367_v4 }
 0x89f   :  { %2710 = vmatprep.subr.mxu0 %v3374_v5 }
 0x8a0   :  { %2711 = vmatpush3.msra.mxu0 %v3374_v5 }
 0x8a1   :  { %2712 = vmatprep.subr.mxu0 %v3381_v6 }
 0x8a2   :  { %2713 = vmatpush3.msra.mxu0 %v3381_v6 }
 0x8a3   :  { %2714 = vmatprep.subr.mxu0 %v3388_v7 }
 0x8a4   :  { %2715 = vmatpush3.msra.mxu0 %v3388_v7 }
 0x8a5   :  { %2716 = vmatprep.subr.mxu0 %v3395_v8 }
 0x8a6   :  { %2717 = vmatpush3.msra.mxu0 %v3395_v8 }
 0x8a7   :  { %2718 = vmatprep.subr.mxu0 %v3402_v9 }
 0x8a8   :  { %2719 = vmatpush3.msra.mxu0 %v3402_v9 }
 0x8a9   :  { %2720 = vmatprep.subr.mxu0 %v3442_v14 }
 0x8aa   :  { %2721 = vmatpush3.msra.mxu0 %v3442_v14 }
 0x8ab   :  { %2722 = vmatprep.subr.mxu0 %v3450_v15 }
 0x8ac   :  { %2723 = vmatpush3.msra.mxu0 %v3450_v15 }
 0x94d   :  { %v2656_v58 = vpop.f32.mrf.mxu0 }
 0x94e   :  { %v1780_v61 = vmul.f32 %v2656_v58, %v2656_v58 }
 0x94f   :  { %v1691_v59 = vpop.f32.mrf.mxu0 }
 0x950   :  { %v1779_v60 = vmul.f32 %v1691_v59, %v1691_v59  ;;  %2689 = vmatprep.mubr.f32.mxu1 %v1691_v59 }
 0x951   :  { %2690 = vmatmul.mubr.f32.vlgmr.msra.gmra.mxu1 %v2656_v58 }
 0x952   :  { %2724 = vmatprep.mubr.f32.mxu0 %v1779_v60  ;;  %2728 = vmatpush3.msra.mxu1 %v3502_v20 }
 0x953   :  { %2725 = vmatmul.mubr.f32.vlgmr.msra.gmra.mxu0 %v1780_v61  ;;  %2732 = vmatprep.subr.mxu1 %v3502_v20 }
 0xa11   :  { %v2691_v62 = vpop.f32.mrf.mxu1 }
 0xa12   :  { %v1857_v63 = vmul.f32 0.0625, %v2691_v62 }
 0xa13   :  { %v1770_v1 = vpop.f32.mrf.mxu1  ;;  %v2726_v2 = vpop.f32.mrf.mxu0 }
 0xa14   :  { %v1861_v4 = vmul.f32 %v1857_v63, %v1857_v63  ;;  %v1856_v5 = vmul.f32 0.0625, %v1770_v1  ;;  %v1859_v6 = vmul.f32 0.0625, %v2726_v2 }
 0xa15   :  { %v1847_v7 = vpop.f32.mrf.mxu0 }
 0xa16   :  { %v1860_v8 = vmul.f32 %v1856_v5, %v1856_v5  ;;  %v1863_v9 = vsub.f32 %v1859_v6, %v1861_v4  ;;  %v1858_v14 = vmul.f32 0.0625, %v1847_v7 }
 0xa18   :  { %v1865_v15 = vmax.f32 %v1863_v9, 0.0  ;;  %v1862_v16 = vsub.f32 %v1858_v14, %v1860_v8 }
 0xa1a   :  { %v1867_v17 = vadd.f32 1e-05, %v1865_v15  ;;  %v1864_v33 = vmax.f32 %v1862_v16, 0.0 }
 0xa1c   :  { %2755 = vrsqrt.f32 %v1867_v17  ;;  %v1866_v34 = vadd.f32 1e-05, %v1864_v33 }
 0xa1e   :  { %2757 = vrsqrt.f32 %v1866_v34 }
 0xa29   :  { %v2756_v35 = vpop.eup %2755 }
 0xa2a   :  { %v1881_v38 = vmul.f32 %v2756_v35, %v1878_v37 }
 0xa2b   :  { %v2758_v39 = vpop.eup %2757 }
 0xa2c   :  { %v1880_v40 = vmul.f32 %v2758_v39, %v1873_v36  ;;  %v1883_v41 = vmul.f32 %v1881_v38, %v1857_v63 }
 0xa2e   :  { %2729 = vmatprep.mubr.msk.f32.mxu1 %vm74_vm0, %v1880_v40  ;;  %v1882_v42 = vmul.f32 %v1880_v40, %v1856_v5  ;;  %v1895_v46 = vsub.f32 %v1892_v44, %v1883_v41 }
 0xa2f   :  { %2730 = vmatmul.mubr.msk.f32.vlgmr.msra.gmra.mxu1 %vm74_vm0, %v1881_v38 }
 0xa30   :  { %2733 = vmatpush3.msra.mxu1 %v3502_v20  ;;  %v1894_v45 = vsub.f32 %v1887_v43, %v1882_v42 }
 0xa32   :  { %2734 = vmatprep.mubr.msk.f32.mxu1 %vm74_vm0, %v1894_v45 }
 0xa33   :  { %2735 = vmatmul.mubr.msk.f32.vlgmr.msra.gmra.mxu1 %vm74_vm0, %v1895_v46 }
 0xaef   :  { %v2731_v47 = vpop.f32.mrf.mxu1 }
 0xaf0   :  { %v1978_v49 = vmul.f32 %v2731_v47, %v2656_v58 }
 0xaf1   :  { %v1968_v48 = vpop.f32.mrf.mxu1 }
 0xaf2   :  { %v1977_v51 = vmul.f32 %v1968_v48, %v1691_v59 }
 0xaf3   :  { %v2736_v50 = vpop.f32.mrf.mxu1 }
 0xaf4   :  { %v2061_v0 = vadd.f32 %v2736_v50, %v1978_v49 }
 0xaf5   :  { %v2051_v52 = vpop.f32.mrf.mxu1 }
 0xaf6   :  { %v2063_v53 = vadd.f32 %v2061_v0, %v3576_v28  ;;  %v2060_v54 = vadd.f32 %v2051_v52, %v1977_v51 }
 0xaf8   :  { %v2065_v55 = vmax.f32 %v2063_v53, 0.0  ;;  %v2062_v20 = vadd.f32 %v2060_v54, %v3578_v30 }
 0xafa   :  { %2067 = vst [vmem:[#allocation2 + $0x8] sm:$0xff] %v2065_v55  ;;  %v2064_v56 = vmax.f32 %v2062_v20, 0.0 }
 0xafc   :  { %2066 = vst [vmem:[#allocation2] sm:$0xff] %v2064_v56 }
 0xafd   :  { %2771 = shalt.err (!%p2768_p4)
}
 0xafe   :  { %s2788_s5 = smov 128   ;;  %s2789_s29 = smov 8  }
 0xaff   :  { %2079 = dma.vmem_to_hbm [thread:$0]  %s2074_s23, 256, %s3645_s22, [#allocation3], %s2788_s5, %s2788_s5, %s2789_s29  }
 0xb00   :  { %2780 = dma.done.wait [#allocation3], 256  }
 0xb01   :  { %2781 = vsyncadd [#allocation3], 4294967040 }
 0xb02   :  { %2083 = vsyncpa [#allocation3], 1 }

</bundles_post_ra>
